<compile_context>
chip_gen: v6e
topology: v6e:2x2x1
jax: 0.10.0
libtpu: 0.0.40
codegen_flags: <defaults>
</compile_context>

<pallas_src>
import math

import jax
import jax.numpy as jnp
import numpy as np
from jax.experimental import pallas as pl
from jax.experimental.pallas import tpu as pltpu


def _pick_head_group(num_heads, head_dim, lane_target):
    """Largest divisor of num_heads with group_width ~<= lane_target."""
    g = max(1, min(num_heads, lane_target // max(head_dim, 1)))
    while num_heads % g:
        g -= 1
    return g


def _pick_q_tile(sq, target):
    """Largest multiple of 8 <= target that divides sq (or sq if untileable)."""
    if sq <= target:
        return sq
    t = (min(target, sq) // 8) * 8
    while t > 8 and sq % t != 0:
        t -= 8
    return t if sq % t == 0 else sq


def _vmem_limit_bytes():
    """Per-generation scoped-VMEM limit (leave headroom for Mosaic scratch)."""
    cap = 64 * 1024 * 1024
    try:
        info = pltpu.get_tpu_info()
        cap = int(getattr(info, "vmem_capacity_bytes", cap))
    except Exception:
        pass
    return min((cap * 3) // 4, 100 * 1024 * 1024)


def _make_mha_kernel(G, hd, has_mask):
    """Kernel for one (batch, q_tile, head_group) grid step."""

    def kernel(*refs):
        if has_mask:
            (q_ref, k_ref, v_ref, mbias_ref,
             wq_ref, bq_ref, wk_ref, bk_ref, wv_ref, bv_ref,
             wo_ref, bo_ref, out_ref, attn_ref, acc_ref) = refs
        else:
            (q_ref, k_ref, v_ref,
             wq_ref, bq_ref, wk_ref, bk_ref, wv_ref, bv_ref,
             wo_ref, bo_ref, out_ref, attn_ref, acc_ref) = refs
            mbias_ref = None

        hg = pl.program_id(2)
        last_hg = pl.num_programs(2) - 1

        q_in = q_ref[0]          # (tq, D) bf16
        k_in = k_ref[0]          # (Sk, D) bf16
        v_in = v_ref[0]          # (Sk, D) bf16

        # Group-wide projections: N = G*hd fills the MXU lane width.
        # (1/sqrt(hd) score scale is already folded into wq/bq.)
        q_g = (jnp.dot(q_in, wq_ref[hg], preferred_element_type=jnp.float32)
               + bq_ref[hg]).astype(jnp.bfloat16)          # (tq, G*hd)
        k_g = (jnp.dot(k_in, wk_ref[hg], preferred_element_type=jnp.float32)
               + bk_ref[hg]).astype(jnp.bfloat16)          # (Sk, G*hd)
        v_g = (jnp.dot(v_in, wv_ref[hg], preferred_element_type=jnp.float32)
               + bv_ref[hg]).astype(jnp.bfloat16)          # (Sk, G*hd)

        if has_mask:
            m_bias = mbias_ref[0].astype(jnp.float32)      # (tq, Sk)

        ctx_parts = []
        for g in range(G):                                  # static unrolled
            sl = slice(g * hd, (g + 1) * hd)
            qh = q_g[:, sl]
            kh = k_g[:, sl]
            vh = v_g[:, sl]

            # Scores: contract head dim directly (no materialized k.T).
            scores = jax.lax.dot_general(
                qh, kh, (((1,), (1,)), ((), ())),
                preferred_element_type=jnp.float32)        # (tq, Sk)
            if has_mask:
                scores = scores + m_bias

            # Softmax over keys; reciprocal goes to the EUP slot.
            m = jnp.max(scores, axis=-1, keepdims=True)
            e = jnp.exp(scores - m)
            s = jnp.sum(e, axis=-1, keepdims=True)
            w_bf = (e * pl.reciprocal(s, approx=True)).astype(jnp.bfloat16)

            attn_ref[0, g] = w_bf                          # bf16 writeback

            # Dropout is identity in eval mode.
            ctx_parts.append(jnp.dot(w_bf, vh,
                                     preferred_element_type=jnp.float32))

        # Output projection for the whole group: K = G*hd (full contraction).
        ctx_g = jnp.concatenate(ctx_parts, axis=-1).astype(jnp.bfloat16)
        head_out = jnp.dot(ctx_g, wo_ref[hg],
                           preferred_element_type=jnp.float32)   # (tq, D) f32

        @pl.when(hg == 0)
        def _():
            acc_ref[...] = head_out + bo_ref[...]

        @pl.when(hg != 0)
        def _():
            acc_ref[...] = acc_ref[...] + head_out

        @pl.when(hg == last_hg)
        def _():
            out_ref[0] = acc_ref[...].astype(out_ref.dtype)

    return kernel


def interpretable_mha(query, key, value, params, mask=None, *, num_heads,
                      q_tile=256, lane_target=256):
    """Pallas wrapper reproducing InterpretableMultiHeadAttention.forward.

    Returns (output, attention_weights), both bfloat16.
    lane_target ~ MXU width: 256 on v6e/v7x, 128 on v5e.
    """
    B, Sq, D = query.shape
    Sk = key.shape[1]
    H = num_heads
    assert D % H == 0
    hd = D // H

    wq, bq, wk, bk, wv, bv, wo, bo = params

    # Fold the 1/sqrt(head_dim) score scaling into the query projection.
    scale = 1.0 / math.sqrt(hd)
    wq = wq * scale
    bq = bq * scale

    G = _pick_head_group(H, hd, lane_target)   # heads per grid step
    HG = H // G                                # head groups (grid axis 2)
    Ghd = G * hd
    tq = _pick_q_tile(Sq, q_tile)
    NQ = Sq // tq

    def group_cols(w):        # (D, D) -> (HG, D, G*hd)   columns per group
        return w.reshape(D, HG, Ghd).transpose(1, 0, 2)

    def group_bias(b):        # (1, D) -> (HG, 1, G*hd)
        return b.reshape(1, HG, Ghd).transpose(1, 0, 2)

    wq_h = group_cols(wq).astype(jnp.bfloat16)
    wk_h = group_cols(wk).astype(jnp.bfloat16)
    wv_h = group_cols(wv).astype(jnp.bfloat16)
    wo_h = wo.reshape(HG, Ghd, D).astype(jnp.bfloat16)    # rows per group
    bq_h = group_bias(bq).astype(jnp.float32)
    bk_h = group_bias(bk).astype(jnp.float32)
    bv_h = group_bias(bv).astype(jnp.float32)
    bo_f = bo.astype(jnp.float32)

    q_bf = query.astype(jnp.bfloat16)
    k_bf = key.astype(jnp.bfloat16)
    v_bf = value.astype(jnp.bfloat16)

    has_mask = mask is not None

    operands = [q_bf, k_bf, v_bf]
    in_specs = [
        pl.BlockSpec((1, tq, D), lambda b, qi, hg: (b, qi, 0)),
        pl.BlockSpec((1, Sk, D), lambda b, qi, hg: (b, 0, 0)),
        pl.BlockSpec((1, Sk, D), lambda b, qi, hg: (b, 0, 0)),
    ]
    if has_mask:
        # bf16 additive bias (half the HBM read of f32); computed once here.
        mbias = jnp.where(mask == 0, -1000000000.0, 0.0).astype(jnp.bfloat16)
        operands.append(mbias)
        in_specs.append(pl.BlockSpec((1, tq, Sk), lambda b, qi, hg: (b, qi, 0)))

    # Weights: full slabs with a constant index_map -> fetched once, resident.
    const3 = lambda b, qi, hg: (0, 0, 0)
    operands += [wq_h, bq_h, wk_h, bk_h, wv_h, bv_h, wo_h, bo_f]
    in_specs += [
        pl.BlockSpec((HG, D, Ghd), const3),
        pl.BlockSpec((HG, 1, Ghd), const3),
        pl.BlockSpec((HG, D, Ghd), const3),
        pl.BlockSpec((HG, 1, Ghd), const3),
        pl.BlockSpec((HG, D, Ghd), const3),
        pl.BlockSpec((HG, 1, Ghd), const3),
        pl.BlockSpec((HG, Ghd, D), const3),
        pl.BlockSpec((1, D), lambda b, qi, hg: (0, 0)),
    ]

    kernel = _make_mha_kernel(G, hd, has_mask)

    out, attn = pl.pallas_call(
        kernel,
        out_shape=(
            jax.ShapeDtypeStruct((B, Sq, D), jnp.bfloat16),
            jax.ShapeDtypeStruct((B, H, Sq, Sk), jnp.bfloat16),
        ),
        grid=(B, NQ, HG),
        in_specs=in_specs,
        out_specs=(
            # Output block resident across the head-group axis; written once.
            pl.BlockSpec((1, tq, D), lambda b, qi, hg: (b, qi, 0)),
            pl.BlockSpec((1, G, tq, Sk), lambda b, qi, hg: (b, hg, qi, 0)),
        ),
        scratch_shapes=[pltpu.VMEM((tq, D), jnp.float32)],   # f32 accumulator
        compiler_params=pltpu.CompilerParams(
            dimension_semantics=("parallel", "parallel", "arbitrary"),
            vmem_limit_bytes=_vmem_limit_bytes(),
        ),
    )(*operands)
    return out, attn


def init_params(key, d_model):
    """PyTorch-Linear-style init (uniform +/- 1/sqrt(fan_in)).

    Weights stored pre-transposed, shape (in, out) == (D, D), so x @ W equals
    torch's x @ W_torch.T.  Biases stored as (1, D).
    """
    bound = 1.0 / math.sqrt(d_model)
    keys = jax.random.split(key, 8)
    params = []
    for i in range(4):
        w = jax.random.uniform(keys[2 * i], (d_model, d_model), jnp.float32,
                               -bound, bound)
        b = jax.random.uniform(keys[2 * i + 1], (1, d_model), jnp.float32,
                               -bound, bound)
        params += [w, b]
    return tuple(params)


def reference_mha(query, key, value, params, mask=None, *, num_heads):
    """Pure-JAX f32 reference mirroring the PyTorch forward (eval mode)."""
    wq, bq, wk, bk, wv, bv, wo, bo = params
    B, Sq, D = query.shape
    Sk = key.shape[1]
    hd = D // num_heads

    def proj(x, w, b):
        return x @ w + b

    def split_heads(x, S):
        return x.reshape(B, S, num_heads, hd).transpose(0, 2, 1, 3)

    q = split_heads(proj(query, wq, bq), Sq)
    k = split_heads(proj(key, wk, bk), Sk)
    v = split_heads(proj(value, wv, bv), Sk)

    scores = jnp.einsum("bhqd,bhkd->bhqk", q, k) / math.sqrt(hd)
    if mask is not None:
        scores = jnp.where(mask[:, None, :, :] == 0, -1000000000.0, scores)
    attn = jax.nn.softmax(scores, axis=-1)
    ctx = jnp.einsum("bhqk,bhkd->bhqd", attn, v)
    ctx = ctx.transpose(0, 2, 1, 3).reshape(B, Sq, D)
    out = ctx @ wo + bo
    return out, attn


if __name__ == "__main__":
    # NOTE: these small shapes exercise correctness only; benchmark with
    # Sq,Sk >= 512, D >= 512, hd in {64,128} to see the MXU/DMA behavior.
    B, S, D, H = 2, 8, 32, 4

    root = jax.random.PRNGKey(0)
    k_q, k_k, k_v, k_p = jax.random.split(root, 4)
    query = jax.random.normal(k_q, (B, S, D), jnp.float32)
    key = jax.random.normal(k_k, (B, S, D), jnp.float32)
    value = jax.random.normal(k_v, (B, S, D), jnp.float32)
    params = init_params(k_p, D)

    # bf16 operands + bf16 outputs (f32 accumulation) => loosened tolerances.
    OUT_TOL = dict(rtol=5e-2, atol=5e-2)
    ATTN_TOL = dict(rtol=3e-2, atol=3e-2)

    def to_np_f32(x):
        return np.asarray(x.astype(jnp.float32))

    # --- unmasked ---
    out, attn = interpretable_mha(query, key, value, params, mask=None,
                                  num_heads=H)
    out = jax.block_until_ready(out)
    attn = jax.block_until_ready(attn)
    ref_out, ref_attn = reference_mha(query, key, value, params, mask=None,
                                      num_heads=H)
    np.testing.assert_allclose(to_np_f32(out), np.asarray(ref_out), **OUT_TOL)
    np.testing.assert_allclose(to_np_f32(attn), np.asarray(ref_attn), **ATTN_TOL)
    assert out.shape == (B, S, D) and attn.shape == (B, H, S, S)

    # --- causal mask ---
    causal = jnp.broadcast_to(jnp.tril(jnp.ones((S, S), jnp.float32)), (B, S, S))
    out_m, attn_m = interpretable_mha(query, key, value, params, mask=causal,
                                      num_heads=H)
    out_m = jax.block_until_ready(out_m)
    attn_m = jax.block_until_ready(attn_m)
    ref_out_m, ref_attn_m = reference_mha(query, key, value, params,
                                          mask=causal, num_heads=H)
    np.testing.assert_allclose(to_np_f32(out_m), np.asarray(ref_out_m), **OUT_TOL)
    np.testing.assert_allclose(to_np_f32(attn_m), np.asarray(ref_attn_m), **ATTN_TOL)

    print("KERNEL_OK")
</pallas_src>

<mosaic_0001>
module attributes {stable_mosaic.version = 11 : i64} {
  func.func @kernel(%arg0: i32, %arg1: i32, %arg2: i32, %arg3: memref<1x8x32xbf16, #tpu.memory_space<vmem>>, %arg4: memref<1x8x32xbf16, #tpu.memory_space<vmem>>, %arg5: memref<1x8x32xbf16, #tpu.memory_space<vmem>>, %arg6: memref<1x32x32xbf16, #tpu.memory_space<vmem>>, %arg7: memref<1x1x32xf32, #tpu.memory_space<vmem>>, %arg8: memref<1x32x32xbf16, #tpu.memory_space<vmem>>, %arg9: memref<1x1x32xf32, #tpu.memory_space<vmem>>, %arg10: memref<1x32x32xbf16, #tpu.memory_space<vmem>>, %arg11: memref<1x1x32xf32, #tpu.memory_space<vmem>>, %arg12: memref<1x32x32xbf16, #tpu.memory_space<vmem>>, %arg13: memref<1x32xf32, #tpu.memory_space<vmem>>, %arg14: memref<1x8x32xbf16, #tpu.memory_space<vmem>>, %arg15: memref<1x4x8x8xbf16, #tpu.memory_space<vmem>>, %arg16: memref<8x32xf32, #tpu.memory_space<vmem>>) attributes {dimension_semantics = [#tpu.dimension_semantics<parallel>, #tpu.dimension_semantics<parallel>, #tpu.dimension_semantics<arbitrary>], iteration_bounds = array<i64: 2, 1, 1>, scalar_prefetch = 0 : i64, scratch_operands = 1 : i64, tpu.core_type = #tpu.core_type<tc>, window_params = [{transform_indices = @transform_0, window_bounds = array<i64: 1, 8, 32>}, {transform_indices = @transform_1, window_bounds = array<i64: 1, 8, 32>}, {transform_indices = @transform_2, window_bounds = array<i64: 1, 8, 32>}, {pipeline_mode = #tpu.pipeline_mode<synchronous>, transform_indices = @transform_3, window_bounds = array<i64: 1, 32, 32>}, {pipeline_mode = #tpu.pipeline_mode<synchronous>, transform_indices = @transform_4, window_bounds = array<i64: 1, 1, 32>}, {pipeline_mode = #tpu.pipeline_mode<synchronous>, transform_indices = @transform_5, window_bounds = array<i64: 1, 32, 32>}, {pipeline_mode = #tpu.pipeline_mode<synchronous>, transform_indices = @transform_6, window_bounds = array<i64: 1, 1, 32>}, {pipeline_mode = #tpu.pipeline_mode<synchronous>, transform_indices = @transform_7, window_bounds = array<i64: 1, 32, 32>}, {pipeline_mode = #tpu.pipeline_mode<synchronous>, transform_indices = @transform_8, window_bounds = array<i64: 1, 1, 32>}, {pipeline_mode = #tpu.pipeline_mode<synchronous>, transform_indices = @transform_9, window_bounds = array<i64: 1, 32, 32>}, {pipeline_mode = #tpu.pipeline_mode<synchronous>, transform_indices = @transform_10, window_bounds = array<i64: 1, 32>}, {transform_indices = @transform_11, window_bounds = array<i64: 1, 8, 32>}, {transform_indices = @transform_12, window_bounds = array<i64: 1, 4, 8, 8>}]} {
    %c0 = arith.constant 0 : index
    %c0_0 = arith.constant 0 : index
    %c0_1 = arith.constant 0 : index
    %0 = vector.load %arg3[%c0, %c0_0, %c0_1] : memref<1x8x32xbf16, #tpu.memory_space<vmem>>, vector<1x8x32xbf16>
    %1 = vector.shape_cast %0 : vector<1x8x32xbf16> to vector<8x32xbf16>
    %c0_2 = arith.constant 0 : index
    %c0_3 = arith.constant 0 : index
    %c0_4 = arith.constant 0 : index
    %2 = vector.load %arg4[%c0_2, %c0_3, %c0_4] : memref<1x8x32xbf16, #tpu.memory_space<vmem>>, vector<1x8x32xbf16>
    %3 = vector.shape_cast %2 : vector<1x8x32xbf16> to vector<8x32xbf16>
    %c0_5 = arith.constant 0 : index
    %c0_6 = arith.constant 0 : index
    %c0_7 = arith.constant 0 : index
    %4 = vector.load %arg5[%c0_5, %c0_6, %c0_7] : memref<1x8x32xbf16, #tpu.memory_space<vmem>>, vector<1x8x32xbf16>
    %5 = vector.shape_cast %4 : vector<1x8x32xbf16> to vector<8x32xbf16>
    %6 = arith.index_cast %arg2 : i32 to index
    %c0_8 = arith.constant 0 : index
    %c0_9 = arith.constant 0 : index
    %7 = vector.load %arg6[%6, %c0_8, %c0_9] : memref<1x32x32xbf16, #tpu.memory_space<vmem>>, vector<1x32x32xbf16>
    %8 = vector.shape_cast %7 : vector<1x32x32xbf16> to vector<32x32xbf16>
    %cst = arith.constant dense<0.000000e+00> : vector<8x32xf32>
    %9 = tpu.matmul %1, %8, %cst {dimension_numbers = #tpu.dot_dimension_numbers<[1], [0], [0], [1], [0, 0, 1, 1], [], []>} : vector<8x32xbf16>, vector<32x32xbf16>, vector<8x32xf32> -> vector<8x32xf32>
    %10 = arith.index_cast %arg2 : i32 to index
    %c0_10 = arith.constant 0 : index
    %c0_11 = arith.constant 0 : index
    %11 = vector.load %arg7[%10, %c0_10, %c0_11] : memref<1x1x32xf32, #tpu.memory_space<vmem>>, vector<1x1x32xf32>
    %12 = vector.shape_cast %11 : vector<1x1x32xf32> to vector<1x32xf32>
    %13 = vector.broadcast %12 : vector<1x32xf32> to vector<8x32xf32>
    %14 = arith.addf %9, %13 : vector<8x32xf32>
    %15 = arith.truncf %14 : vector<8x32xf32> to vector<8x32xbf16>
    %16 = arith.index_cast %arg2 : i32 to index
    %c0_12 = arith.constant 0 : index
    %c0_13 = arith.constant 0 : index
    %17 = vector.load %arg8[%16, %c0_12, %c0_13] : memref<1x32x32xbf16, #tpu.memory_space<vmem>>, vector<1x32x32xbf16>
    %18 = vector.shape_cast %17 : vector<1x32x32xbf16> to vector<32x32xbf16>
    %cst_14 = arith.constant dense<0.000000e+00> : vector<8x32xf32>
    %19 = tpu.matmul %3, %18, %cst_14 {dimension_numbers = #tpu.dot_dimension_numbers<[1], [0], [0], [1], [0, 0, 1, 1], [], []>} : vector<8x32xbf16>, vector<32x32xbf16>, vector<8x32xf32> -> vector<8x32xf32>
    %20 = arith.index_cast %arg2 : i32 to index
    %c0_15 = arith.constant 0 : index
    %c0_16 = arith.constant 0 : index
    %21 = vector.load %arg9[%20, %c0_15, %c0_16] : memref<1x1x32xf32, #tpu.memory_space<vmem>>, vector<1x1x32xf32>
    %22 = vector.shape_cast %21 : vector<1x1x32xf32> to vector<1x32xf32>
    %23 = vector.broadcast %22 : vector<1x32xf32> to vector<8x32xf32>
    %24 = arith.addf %19, %23 : vector<8x32xf32>
    %25 = arith.truncf %24 : vector<8x32xf32> to vector<8x32xbf16>
    %26 = arith.index_cast %arg2 : i32 to index
    %c0_17 = arith.constant 0 : index
    %c0_18 = arith.constant 0 : index
    %27 = vector.load %arg10[%26, %c0_17, %c0_18] : memref<1x32x32xbf16, #tpu.memory_space<vmem>>, vector<1x32x32xbf16>
    %28 = vector.shape_cast %27 : vector<1x32x32xbf16> to vector<32x32xbf16>
    %cst_19 = arith.constant dense<0.000000e+00> : vector<8x32xf32>
    %29 = tpu.matmul %5, %28, %cst_19 {dimension_numbers = #tpu.dot_dimension_numbers<[1], [0], [0], [1], [0, 0, 1, 1], [], []>} : vector<8x32xbf16>, vector<32x32xbf16>, vector<8x32xf32> -> vector<8x32xf32>
    %30 = arith.index_cast %arg2 : i32 to index
    %c0_20 = arith.constant 0 : index
    %c0_21 = arith.constant 0 : index
    %31 = vector.load %arg11[%30, %c0_20, %c0_21] : memref<1x1x32xf32, #tpu.memory_space<vmem>>, vector<1x1x32xf32>
    %32 = vector.shape_cast %31 : vector<1x1x32xf32> to vector<1x32xf32>
    %33 = vector.broadcast %32 : vector<1x32xf32> to vector<8x32xf32>
    %34 = arith.addf %29, %33 : vector<8x32xf32>
    %35 = arith.truncf %34 : vector<8x32xf32> to vector<8x32xbf16>
    %36 = vector.extract_strided_slice %15 {offsets = [0, 0], sizes = [8, 8], strides = [1, 1]} : vector<8x32xbf16> to vector<8x8xbf16>
    %37 = vector.extract_strided_slice %25 {offsets = [0, 0], sizes = [8, 8], strides = [1, 1]} : vector<8x32xbf16> to vector<8x8xbf16>
    %38 = vector.extract_strided_slice %35 {offsets = [0, 0], sizes = [8, 8], strides = [1, 1]} : vector<8x32xbf16> to vector<8x8xbf16>
    %cst_22 = arith.constant dense<0.000000e+00> : vector<8x8xf32>
    %39 = tpu.matmul %36, %37, %cst_22 {dimension_numbers = #tpu.dot_dimension_numbers<[1], [1], [0], [0], [0, 0, 1, 0], [], []>} : vector<8x8xbf16>, vector<8x8xbf16>, vector<8x8xf32> -> vector<8x8xf32>
    %cst_23 = arith.constant dense<0xFF800000> : vector<8xf32>
    %40 = vector.multi_reduction <maximumf>, %39, %cst_23 [1] : vector<8x8xf32> to vector<8xf32>
    %41 = vector.shape_cast %40 : vector<8xf32> to vector<8x1xf32>
    %42 = vector.broadcast %41 : vector<8x1xf32> to vector<8x8xf32>
    %43 = arith.subf %39, %42 : vector<8x8xf32>
    %44 = math.exp %43 : vector<8x8xf32>
    %cst_24 = arith.constant dense<0.000000e+00> : vector<8xf32>
    %45 = vector.multi_reduction <add>, %44, %cst_24 [1] : vector<8x8xf32> to vector<8xf32>
    %46 = vector.shape_cast %45 : vector<8xf32> to vector<8x1xf32>
    %47 = tpu.reciprocal %46 {approx = true} : vector<8x1xf32> -> vector<8x1xf32>
    %48 = vector.broadcast %47 : vector<8x1xf32> to vector<8x8xf32>
    %49 = arith.mulf %44, %48 : vector<8x8xf32>
    %50 = arith.truncf %49 : vector<8x8xf32> to vector<8x8xbf16>
    %c0_25 = arith.constant 0 : index
    %c0_26 = arith.constant 0 : index
    %c0_27 = arith.constant 0 : index
    %c0_28 = arith.constant 0 : index
    %51 = vector.load %arg15[%c0_25, %c0_26, %c0_27, %c0_28] : memref<1x4x8x8xbf16, #tpu.memory_space<vmem>>, vector<1x1x8x8xbf16>
    %52 = vector.shape_cast %51 : vector<1x1x8x8xbf16> to vector<8x8xbf16>
    %53 = vector.shape_cast %50 : vector<8x8xbf16> to vector<1x1x8x8xbf16>
    tpu.vector_store %arg15[%c0_25, %c0_26, %c0_27, %c0_28], %53 {strides = array<i32>} : memref<1x4x8x8xbf16, #tpu.memory_space<vmem>>, vector<1x1x8x8xbf16>,
    %cst_29 = arith.constant dense<0.000000e+00> : vector<8x8xf32>
    %54 = tpu.matmul %50, %38, %cst_29 {dimension_numbers = #tpu.dot_dimension_numbers<[1], [0], [0], [1], [0, 0, 1, 1], [], []>} : vector<8x8xbf16>, vector<8x8xbf16>, vector<8x8xf32> -> vector<8x8xf32>
    %55 = vector.extract_strided_slice %15 {offsets = [0, 8], sizes = [8, 8], strides = [1, 1]} : vector<8x32xbf16> to vector<8x8xbf16>
    %56 = vector.extract_strided_slice %25 {offsets = [0, 8], sizes = [8, 8], strides = [1, 1]} : vector<8x32xbf16> to vector<8x8xbf16>
    %57 = vector.extract_strided_slice %35 {offsets = [0, 8], sizes = [8, 8], strides = [1, 1]} : vector<8x32xbf16> to vector<8x8xbf16>
    %cst_30 = arith.constant dense<0.000000e+00> : vector<8x8xf32>
    %58 = tpu.matmul %55, %56, %cst_30 {dimension_numbers = #tpu.dot_dimension_numbers<[1], [1], [0], [0], [0, 0, 1, 0], [], []>} : vector<8x8xbf16>, vector<8x8xbf16>, vector<8x8xf32> -> vector<8x8xf32>
    %cst_31 = arith.constant dense<0xFF800000> : vector<8xf32>
    %59 = vector.multi_reduction <maximumf>, %58, %cst_31 [1] : vector<8x8xf32> to vector<8xf32>
    %60 = vector.shape_cast %59 : vector<8xf32> to vector<8x1xf32>
    %61 = vector.broadcast %60 : vector<8x1xf32> to vector<8x8xf32>
    %62 = arith.subf %58, %61 : vector<8x8xf32>
    %63 = math.exp %62 : vector<8x8xf32>
    %cst_32 = arith.constant dense<0.000000e+00> : vector<8xf32>
    %64 = vector.multi_reduction <add>, %63, %cst_32 [1] : vector<8x8xf32> to vector<8xf32>
    %65 = vector.shape_cast %64 : vector<8xf32> to vector<8x1xf32>
    %66 = tpu.reciprocal %65 {approx = true} : vector<8x1xf32> -> vector<8x1xf32>
    %67 = vector.broadcast %66 : vector<8x1xf32> to vector<8x8xf32>
    %68 = arith.mulf %63, %67 : vector<8x8xf32>
    %69 = arith.truncf %68 : vector<8x8xf32> to vector<8x8xbf16>
    %c0_33 = arith.constant 0 : index
    %c1 = arith.constant 1 : index
    %c0_34 = arith.constant 0 : index
    %c0_35 = arith.constant 0 : index
    %70 = vector.load %arg15[%c0_33, %c1, %c0_34, %c0_35] : memref<1x4x8x8xbf16, #tpu.memory_space<vmem>>, vector<1x1x8x8xbf16>
    %71 = vector.shape_cast %70 : vector<1x1x8x8xbf16> to vector<8x8xbf16>
    %72 = vector.shape_cast %69 : vector<8x8xbf16> to vector<1x1x8x8xbf16>
    tpu.vector_store %arg15[%c0_33, %c1, %c0_34, %c0_35], %72 {strides = array<i32>} : memref<1x4x8x8xbf16, #tpu.memory_space<vmem>>, vector<1x1x8x8xbf16>,
    %cst_36 = arith.constant dense<0.000000e+00> : vector<8x8xf32>
    %73 = tpu.matmul %69, %57, %cst_36 {dimension_numbers = #tpu.dot_dimension_numbers<[1], [0], [0], [1], [0, 0, 1, 1], [], []>} : vector<8x8xbf16>, vector<8x8xbf16>, vector<8x8xf32> -> vector<8x8xf32>
    %74 = vector.extract_strided_slice %15 {offsets = [0, 16], sizes = [8, 8], strides = [1, 1]} : vector<8x32xbf16> to vector<8x8xbf16>
    %75 = vector.extract_strided_slice %25 {offsets = [0, 16], sizes = [8, 8], strides = [1, 1]} : vector<8x32xbf16> to vector<8x8xbf16>
    %76 = vector.extract_strided_slice %35 {offsets = [0, 16], sizes = [8, 8], strides = [1, 1]} : vector<8x32xbf16> to vector<8x8xbf16>
    %cst_37 = arith.constant dense<0.000000e+00> : vector<8x8xf32>
    %77 = tpu.matmul %74, %75, %cst_37 {dimension_numbers = #tpu.dot_dimension_numbers<[1], [1], [0], [0], [0, 0, 1, 0], [], []>} : vector<8x8xbf16>, vector<8x8xbf16>, vector<8x8xf32> -> vector<8x8xf32>
    %cst_38 = arith.constant dense<0xFF800000> : vector<8xf32>
    %78 = vector.multi_reduction <maximumf>, %77, %cst_38 [1] : vector<8x8xf32> to vector<8xf32>
    %79 = vector.shape_cast %78 : vector<8xf32> to vector<8x1xf32>
    %80 = vector.broadcast %79 : vector<8x1xf32> to vector<8x8xf32>
    %81 = arith.subf %77, %80 : vector<8x8xf32>
    %82 = math.exp %81 : vector<8x8xf32>
    %cst_39 = arith.constant dense<0.000000e+00> : vector<8xf32>
    %83 = vector.multi_reduction <add>, %82, %cst_39 [1] : vector<8x8xf32> to vector<8xf32>
    %84 = vector.shape_cast %83 : vector<8xf32> to vector<8x1xf32>
    %85 = tpu.reciprocal %84 {approx = true} : vector<8x1xf32> -> vector<8x1xf32>
    %86 = vector.broadcast %85 : vector<8x1xf32> to vector<8x8xf32>
    %87 = arith.mulf %82, %86 : vector<8x8xf32>
    %88 = arith.truncf %87 : vector<8x8xf32> to vector<8x8xbf16>
    %c0_40 = arith.constant 0 : index
    %c2 = arith.constant 2 : index
    %c0_41 = arith.constant 0 : index
    %c0_42 = arith.constant 0 : index
    %89 = vector.load %arg15[%c0_40, %c2, %c0_41, %c0_42] : memref<1x4x8x8xbf16, #tpu.memory_space<vmem>>, vector<1x1x8x8xbf16>
    %90 = vector.shape_cast %89 : vector<1x1x8x8xbf16> to vector<8x8xbf16>
    %91 = vector.shape_cast %88 : vector<8x8xbf16> to vector<1x1x8x8xbf16>
    tpu.vector_store %arg15[%c0_40, %c2, %c0_41, %c0_42], %91 {strides = array<i32>} : memref<1x4x8x8xbf16, #tpu.memory_space<vmem>>, vector<1x1x8x8xbf16>,
    %cst_43 = arith.constant dense<0.000000e+00> : vector<8x8xf32>
    %92 = tpu.matmul %88, %76, %cst_43 {dimension_numbers = #tpu.dot_dimension_numbers<[1], [0], [0], [1], [0, 0, 1, 1], [], []>} : vector<8x8xbf16>, vector<8x8xbf16>, vector<8x8xf32> -> vector<8x8xf32>
    %93 = vector.extract_strided_slice %15 {offsets = [0, 24], sizes = [8, 8], strides = [1, 1]} : vector<8x32xbf16> to vector<8x8xbf16>
    %94 = vector.extract_strided_slice %25 {offsets = [0, 24], sizes = [8, 8], strides = [1, 1]} : vector<8x32xbf16> to vector<8x8xbf16>
    %95 = vector.extract_strided_slice %35 {offsets = [0, 24], sizes = [8, 8], strides = [1, 1]} : vector<8x32xbf16> to vector<8x8xbf16>
    %cst_44 = arith.constant dense<0.000000e+00> : vector<8x8xf32>
    %96 = tpu.matmul %93, %94, %cst_44 {dimension_numbers = #tpu.dot_dimension_numbers<[1], [1], [0], [0], [0, 0, 1, 0], [], []>} : vector<8x8xbf16>, vector<8x8xbf16>, vector<8x8xf32> -> vector<8x8xf32>
    %cst_45 = arith.constant dense<0xFF800000> : vector<8xf32>
    %97 = vector.multi_reduction <maximumf>, %96, %cst_45 [1] : vector<8x8xf32> to vector<8xf32>
    %98 = vector.shape_cast %97 : vector<8xf32> to vector<8x1xf32>
    %99 = vector.broadcast %98 : vector<8x1xf32> to vector<8x8xf32>
    %100 = arith.subf %96, %99 : vector<8x8xf32>
    %101 = math.exp %100 : vector<8x8xf32>
    %cst_46 = arith.constant dense<0.000000e+00> : vector<8xf32>
    %102 = vector.multi_reduction <add>, %101, %cst_46 [1] : vector<8x8xf32> to vector<8xf32>
    %103 = vector.shape_cast %102 : vector<8xf32> to vector<8x1xf32>
    %104 = tpu.reciprocal %103 {approx = true} : vector<8x1xf32> -> vector<8x1xf32>
    %105 = vector.broadcast %104 : vector<8x1xf32> to vector<8x8xf32>
    %106 = arith.mulf %101, %105 : vector<8x8xf32>
    %107 = arith.truncf %106 : vector<8x8xf32> to vector<8x8xbf16>
    %c0_47 = arith.constant 0 : index
    %c3 = arith.constant 3 : index
    %c0_48 = arith.constant 0 : index
    %c0_49 = arith.constant 0 : index
    %108 = vector.load %arg15[%c0_47, %c3, %c0_48, %c0_49] : memref<1x4x8x8xbf16, #tpu.memory_space<vmem>>, vector<1x1x8x8xbf16>
    %109 = vector.shape_cast %108 : vector<1x1x8x8xbf16> to vector<8x8xbf16>
    %110 = vector.shape_cast %107 : vector<8x8xbf16> to vector<1x1x8x8xbf16>
    tpu.vector_store %arg15[%c0_47, %c3, %c0_48, %c0_49], %110 {strides = array<i32>} : memref<1x4x8x8xbf16, #tpu.memory_space<vmem>>, vector<1x1x8x8xbf16>,
    %cst_50 = arith.constant dense<0.000000e+00> : vector<8x8xf32>
    %111 = tpu.matmul %107, %95, %cst_50 {dimension_numbers = #tpu.dot_dimension_numbers<[1], [0], [0], [1], [0, 0, 1, 1], [], []>} : vector<8x8xbf16>, vector<8x8xbf16>, vector<8x8xf32> -> vector<8x8xf32>
    %112 = tpu.concatenate %54, %73, %92, %111 in 1 : vector<8x8xf32>, vector<8x8xf32>, vector<8x8xf32>, vector<8x8xf32> -> vector<8x32xf32>
    %113 = arith.truncf %112 : vector<8x32xf32> to vector<8x32xbf16>
    %114 = arith.index_cast %arg2 : i32 to index
    %c0_51 = arith.constant 0 : index
    %c0_52 = arith.constant 0 : index
    %115 = vector.load %arg12[%114, %c0_51, %c0_52] : memref<1x32x32xbf16, #tpu.memory_space<vmem>>, vector<1x32x32xbf16>
    %116 = vector.shape_cast %115 : vector<1x32x32xbf16> to vector<32x32xbf16>
    %cst_53 = arith.constant dense<0.000000e+00> : vector<8x32xf32>
    %117 = tpu.matmul %113, %116, %cst_53 {dimension_numbers = #tpu.dot_dimension_numbers<[1], [0], [0], [1], [0, 0, 1, 1], [], []>} : vector<8x32xbf16>, vector<32x32xbf16>, vector<8x32xf32> -> vector<8x32xf32>
    %c0_i32 = arith.constant 0 : i32
    %118 = arith.cmpi eq, %arg2, %c0_i32 : i32
    %119 = arith.extui %118 : i1 to i32
    %c0_i32_54 = arith.constant 0 : i32
    %120 = arith.cmpi ne, %119, %c0_i32_54 : i32
    scf.if %120 {
      %c0_59 = arith.constant 0 : index
      %c0_60 = arith.constant 0 : index
      %127 = vector.load %arg13[%c0_59, %c0_60] : memref<1x32xf32, #tpu.memory_space<vmem>>, vector<1x32xf32>
      %128 = vector.broadcast %127 : vector<1x32xf32> to vector<8x32xf32>
      %129 = arith.addf %117, %128 : vector<8x32xf32>
      %c0_61 = arith.constant 0 : index
      %c0_62 = arith.constant 0 : index
      %130 = vector.load %arg16[%c0_61, %c0_62] : memref<8x32xf32, #tpu.memory_space<vmem>>, vector<8x32xf32>
      tpu.vector_store %arg16[%c0_61, %c0_62], %129 {strides = array<i32>} : memref<8x32xf32, #tpu.memory_space<vmem>>, vector<8x32xf32>,
    } else {
    }
    %c0_i32_55 = arith.constant 0 : i32
    %121 = arith.cmpi ne, %arg2, %c0_i32_55 : i32
    %122 = arith.extui %121 : i1 to i32
    %c0_i32_56 = arith.constant 0 : i32
    %123 = arith.cmpi ne, %122, %c0_i32_56 : i32
    scf.if %123 {
      %c0_59 = arith.constant 0 : index
      %c0_60 = arith.constant 0 : index
      %127 = vector.load %arg16[%c0_59, %c0_60] : memref<8x32xf32, #tpu.memory_space<vmem>>, vector<8x32xf32>
      %128 = arith.addf %127, %117 : vector<8x32xf32>
      %c0_61 = arith.constant 0 : index
      %c0_62 = arith.constant 0 : index
      %129 = vector.load %arg16[%c0_61, %c0_62] : memref<8x32xf32, #tpu.memory_space<vmem>>, vector<8x32xf32>
      tpu.vector_store %arg16[%c0_61, %c0_62], %128 {strides = array<i32>} : memref<8x32xf32, #tpu.memory_space<vmem>>, vector<8x32xf32>,
    } else {
    }
    %c0_i32_57 = arith.constant 0 : i32
    %124 = arith.cmpi eq, %arg2, %c0_i32_57 : i32
    %125 = arith.extui %124 : i1 to i32
    %c0_i32_58 = arith.constant 0 : i32
    %126 = arith.cmpi ne, %125, %c0_i32_58 : i32
    scf.if %126 {
      %c0_59 = arith.constant 0 : index
      %c0_60 = arith.constant 0 : index
      %127 = vector.load %arg16[%c0_59, %c0_60] : memref<8x32xf32, #tpu.memory_space<vmem>>, vector<8x32xf32>
      %128 = arith.truncf %127 : vector<8x32xf32> to vector<8x32xbf16>
      %c0_61 = arith.constant 0 : index
      %c0_62 = arith.constant 0 : index
      %c0_63 = arith.constant 0 : index
      %129 = vector.load %arg14[%c0_61, %c0_62, %c0_63] : memref<1x8x32xbf16, #tpu.memory_space<vmem>>, vector<1x8x32xbf16>
      %130 = vector.shape_cast %129 : vector<1x8x32xbf16> to vector<8x32xbf16>
      %131 = vector.shape_cast %128 : vector<8x32xbf16> to vector<1x8x32xbf16>
      tpu.vector_store %arg14[%c0_61, %c0_62, %c0_63], %131 {strides = array<i32>} : memref<1x8x32xbf16, #tpu.memory_space<vmem>>, vector<1x8x32xbf16>,
    } else {
    }
    return
  }
  func.func @transform_0(%arg0: i32, %arg1: i32, %arg2: i32) -> (i32, i32, i32) {
    %c0_i32 = arith.constant 0 : i32
    %c0_i32_0 = arith.constant 0 : i32
    return %arg0, %arg1, %c0_i32 : i32, i32, i32
  }
  func.func @transform_1(%arg0: i32, %arg1: i32, %arg2: i32) -> (i32, i32, i32) {
    %c0_i32 = arith.constant 0 : i32
    %c0_i32_0 = arith.constant 0 : i32
    %c0_i32_1 = arith.constant 0 : i32
    return %arg0, %c0_i32, %c0_i32_0 : i32, i32, i32
  }
  func.func @transform_2(%arg0: i32, %arg1: i32, %arg2: i32) -> (i32, i32, i32) {
    %c0_i32 = arith.constant 0 : i32
    %c0_i32_0 = arith.constant 0 : i32
    %c0_i32_1 = arith.constant 0 : i32
    return %arg0, %c0_i32, %c0_i32_0 : i32, i32, i32
  }
  func.func @transform_3(%arg0: i32, %arg1: i32, %arg2: i32) -> (i32, i32, i32) {
    %c0_i32 = arith.constant 0 : i32
    %c0_i32_0 = arith.constant 0 : i32
    %c0_i32_1 = arith.constant 0 : i32
    %c0_i32_2 = arith.constant 0 : i32
    return %c0_i32, %c0_i32_0, %c0_i32_1 : i32, i32, i32
  }
  func.func @transform_4(%arg0: i32, %arg1: i32, %arg2: i32) -> (i32, i32, i32) {
    %c0_i32 = arith.constant 0 : i32
    %c0_i32_0 = arith.constant 0 : i32
    %c0_i32_1 = arith.constant 0 : i32
    %c0_i32_2 = arith.constant 0 : i32
    return %c0_i32, %c0_i32_0, %c0_i32_1 : i32, i32, i32
  }
  func.func @transform_5(%arg0: i32, %arg1: i32, %arg2: i32) -> (i32, i32, i32) {
    %c0_i32 = arith.constant 0 : i32
    %c0_i32_0 = arith.constant 0 : i32
    %c0_i32_1 = arith.constant 0 : i32
    %c0_i32_2 = arith.constant 0 : i32
    return %c0_i32, %c0_i32_0, %c0_i32_1 : i32, i32, i32
  }
  func.func @transform_6(%arg0: i32, %arg1: i32, %arg2: i32) -> (i32, i32, i32) {
    %c0_i32 = arith.constant 0 : i32
    %c0_i32_0 = arith.constant 0 : i32
    %c0_i32_1 = arith.constant 0 : i32
    %c0_i32_2 = arith.constant 0 : i32
    return %c0_i32, %c0_i32_0, %c0_i32_1 : i32, i32, i32
  }
  func.func @transform_7(%arg0: i32, %arg1: i32, %arg2: i32) -> (i32, i32, i32) {
    %c0_i32 = arith.constant 0 : i32
    %c0_i32_0 = arith.constant 0 : i32
    %c0_i32_1 = arith.constant 0 : i32
    %c0_i32_2 = arith.constant 0 : i32
    return %c0_i32, %c0_i32_0, %c0_i32_1 : i32, i32, i32
  }
  func.func @transform_8(%arg0: i32, %arg1: i32, %arg2: i32) -> (i32, i32, i32) {
    %c0_i32 = arith.constant 0 : i32
    %c0_i32_0 = arith.constant 0 : i32
    %c0_i32_1 = arith.constant 0 : i32
    %c0_i32_2 = arith.constant 0 : i32
    return %c0_i32, %c0_i32_0, %c0_i32_1 : i32, i32, i32
  }
  func.func @transform_9(%arg0: i32, %arg1: i32, %arg2: i32) -> (i32, i32, i32) {
    %c0_i32 = arith.constant 0 : i32
    %c0_i32_0 = arith.constant 0 : i32
    %c0_i32_1 = arith.constant 0 : i32
    %c0_i32_2 = arith.constant 0 : i32
    return %c0_i32, %c0_i32_0, %c0_i32_1 : i32, i32, i32
  }
  func.func @transform_10(%arg0: i32, %arg1: i32, %arg2: i32) -> (i32, i32) {
    %c0_i32 = arith.constant 0 : i32
    %c0_i32_0 = arith.constant 0 : i32
    %c0_i32_1 = arith.constant 0 : i32
    return %c0_i32, %c0_i32_0 : i32, i32
  }
  func.func @transform_11(%arg0: i32, %arg1: i32, %arg2: i32) -> (i32, i32, i32) {
    %c0_i32 = arith.constant 0 : i32
    %c0_i32_0 = arith.constant 0 : i32
    return %arg0, %arg1, %c0_i32 : i32, i32, i32
  }
  func.func @transform_12(%arg0: i32, %arg1: i32, %arg2: i32) -> (i32, i32, i32, i32) {
    %c0_i32 = arith.constant 0 : i32
    %c0_i32_0 = arith.constant 0 : i32
    return %arg0, %arg2, %arg1, %c0_i32 : i32, i32, i32, i32
  }
}

</mosaic_0001>

<bundles_post_ra>
// kernel: tpu_custom_call.1
= control target key start
LH: loop header
LB: loop body
LE: loop exit
PB: predicated region body
PF: predicated region fallthrough
CT: control target
= control target key end

     0   :  { %s2859_s0 = inlined_call_operand.hbm [shape: bf16[2,8,32], index: 0, kind: input, shape index: {}]   ;;  %s2860_s1 = inlined_call_operand.hbm [shape: bf16[2,8,32], index: 1, kind: input, shape index: {}]   ;;  %s2861_s2 = inlined_call_operand.hbm [shape: bf16[2,8,32], index: 2, kind: input, shape index: {}]   ;;  %s2862_s3 = inlined_call_operand.hbm [shape: bf16[1,32,32], index: 3, kind: input, shape index: {}]   ;;  %s2863_s4 = inlined_call_operand.hbm [shape: f32[1,1,32], index: 4, kind: input, shape index: {}]   ;;  %s2864_s5 = inlined_call_operand.hbm [shape: bf16[1,32,32], index: 5, kind: input, shape index: {}]   ;;  %s2865_s6 = inlined_call_operand.hbm [shape: f32[1,1,32], index: 6, kind: input, shape index: {}]   ;;  %s2866_s7 = inlined_call_operand.hbm [shape: bf16[1,32,32], index: 7, kind: input, shape index: {}]   ;;  %s2867_s8 = inlined_call_operand.hbm [shape: f32[1,1,32], index: 8, kind: input, shape index: {}]   ;;  %s2868_s9 = inlined_call_operand.vmem [shape: bf16[1,32,32], index: 9, kind: input, shape index: {}]   ;;  %s2869_s10 = inlined_call_operand.vmem [shape: f32[1,32], index: 10, kind: input, shape index: {}]   ;;  %s2870_s11 = inlined_call_operand.hbm [shape: bf16[2,8,32], index: 11, kind: output, shape index: {0}]   ;;  %s2871_s12 = inlined_call_operand.hbm [shape: bf16[2,4,8,8], index: 12, kind: output, shape index: {1}]  }
   0x1   :  { %2888 = sst [smem:[#allocation34_spill]] %s2862_s3 }
   0x2   :  { %2889 = sst [smem:[#allocation35_spill]] %s2864_s5 }
   0x3   :  { %2890 = sst [smem:[#allocation36_spill]] %s2866_s7 }
   0x4   :  { %2891 = sst [smem:[#allocation37_spill]] %s2869_s10 }
   0x5   :  { %2892 = sst [smem:[#allocation38_spill]] %s2870_s11 }
   0x6   :  { %2893 = sst [smem:[#allocation39_spill]] %s2871_s12 }
   0x7   :  { %18 = vsyncpa [#allocation4], 0 }
   0x8   :  { %20 = vsyncpa [#allocation4 + $0x1], 0 }
   0x9   :  { %21 = vsyncpa [#allocation7], 0 }
   0xa   :  { %23 = vsyncpa [#allocation7 + $0x1], 0 }
   0xb   :  { %24 = vsyncpa [#allocation10], 0 }
   0xc   :  { %25 = vsyncpa [#allocation13], 0 }
   0xd   :  { %26 = vsyncpa [#allocation16], 0 }
   0xe   :  { %27 = vsyncpa [#allocation5], 0 }
   0xf   :  { %29 = vsyncpa [#allocation5 + $0x1], 0 }
  0x10   :  { %30 = vsyncpa [#allocation20], 0 }
  0x11   :  { %32 = vsyncpa [#allocation20 + $0x1], 0  ;;  %s2460_s21 = smov 0   ;;  %s2462_s22 = smov 0  }
  0x12   :  { %s2464_s23 = smov 0   ;;  %s2466_s24 = smov 0  }
  0x13   :  { %s2468_s25 = smov 0   ;;  %s2470_s26 = smov 0  }
  0x14 LB: > { %2894 = sst [smem:[#allocation28_spill]] %s2350_s21  ;;  %s2491_s27 = sadd.s32 4294967295, %s2370_s26   ;;  %s2370_s26 = sphi %s2470_s26, %s38_s26   ;;  %s2366_s25 = sphi %s2468_s25, %s2935_s25   ;;  %s2362_s24 = sphi %s2466_s24, %s2934_s24   ;;  %s2358_s23 = sphi %s2464_s23, %s2938_s23   ;;  %s2354_s22 = sphi %s2462_s22, %s2937_s22   ;;  %s2350_s21 = sphi %s2460_s21, %s2936_s21  }
  0x15   : > { %2895 = sst [smem:[#allocation29_spill]] %s2366_s25  ;;  %p1661_p0 = scmp.ge.s32.totalorder %s2370_s26, 1 }
  0x16   : > { %2896 = sst [smem:[#allocation30_spill]] %s2370_s26  ;;  %p2873_p1 = scmp.eq.s32.totalorder %s2491_s27, 0 }
  0x17   : > { %p368_p2 = scmp.lt.s32.totalorder %s2370_s26, 3  ;;  %s2372_s29 = smov [#allocation9]  }
  0x18   : > { %s380_s30 = sshll.u32 %s2372_s29, 4  ;;  %s2373_s14 = smov [#allocation12]   ;;  %s381_s30 = int_to_ptr.vmem [resolvable:$true] %s380_s30 }
  0x19   : > { %p2496_p3 = pnand %p1661_p0, %p368_p2  ;;  %s404_s15 = sshll.u32 %s2373_s14, 4  ;;  %s405_s15 = int_to_ptr.vmem [resolvable:$true] %s404_s15 }
  0x1a   : > { %s2374_s16 = smov [#allocation15]   ;;  %s2015_s19 = scalar_lea.vmem %s381_s30, 256 }
  0x1b   : > { %s2897_s28 = scalar_select %p2496_p3, 1, 0 }
  0x1c   : > { %p1864_p4 = pneg %p2496_p3  ;;  %s428_s17 = sshll.u32 %s2374_s16, 4  ;;  %s429_s17 = int_to_ptr.vmem [resolvable:$true] %s428_s17 }
  0x1d   : > { %p2016_p8 = scmp.ne.s32.totalorder %s381_s30, %s2015_s19  ;;  %p2023_p11 = scmp.lt.s32.totalorder %s381_s30, %s381_s30 }
  0x1e   : > { %p2505_p6 = pnand %p1864_p4, %p2873_p1  ;;  %p2024_p12 = scmp.lt.s32.totalorder %s2015_s19, %s2015_s19 }
  0x20   : > { %s2898_s13 = scalar_select %p2505_p6, 1, 0 }
  0x21   : > { %p2511_p7 = pneg %p2505_p6  ;;  %p2025_p13 = por %p2024_p12, %p2023_p11 }
  0x23   : > { %p2018_p9 = pnand %p2016_p8, %p2511_p7 }
  0x25   : > { %p2019_p10 = pneg %p2018_p9 }
  0x27   : > { %p2026_p0 = pnand %p2025_p13, %p2019_p10 }
  0x29   : > { %2029 = shalt.err (!%p2026_p0)
}
  0x2a   : > { %s2375_s20 = smov 64   ;;  %s2376_s29 = smov 4  }
  0x2b   : > { %s2900_s3 = sld [smem:[#allocation34_spill]]  ;;  %s2041_s11 = scalar_lea.vmem %s405_s15, 256 }
  0x2c   : > { %p2042_p2 = scmp.ne.s32.totalorder %s405_s15, %s2041_s11  ;;  %p2049_p9 = scmp.lt.s32.totalorder %s405_s15, %s405_s15 }
  0x2d   : > { %p2050_p5 = scmp.lt.s32.totalorder %s2041_s11, %s2041_s11 }
  0x2e   : > { %p2044_p4 = pnand %p2042_p2, %p2511_p7 }
  0x2f   : > { %p2051_p1 = por %p2050_p5, %p2049_p9 }
  0x30   : > { %p2045_p8 = pneg %p2044_p4 }
  0x31   : > { %1867 = dma.hbm_to_vmem [thread:$0]  (!%p2505_p6), %s2900_s3, 256, %s381_s30, [#allocation10], %s2375_s20, %s2375_s20, %s2376_s29  }
  0x32   : > { %p2052_p11 = pnand %p2051_p1, %p2045_p8 }
  0x34   : > { %2055 = shalt.err (!%p2052_p11)
}
  0x35   : > { %s2901_s5 = sld [smem:[#allocation35_spill]]  ;;  %s2067_s14 = scalar_lea.vmem %s429_s17, 256 }
  0x36   : > { %p2068_p10 = scmp.ne.s32.totalorder %s429_s17, %s2067_s14  ;;  %p2075_p0 = scmp.lt.s32.totalorder %s429_s17, %s429_s17 }
  0x37   : > { %p2076_p2 = scmp.lt.s32.totalorder %s2067_s14, %s2067_s14 }
  0x38   : > { %p2070_p12 = pnand %p2068_p10, %p2511_p7 }
  0x39   : > { %p2077_p4 = por %p2076_p2, %p2075_p0 }
  0x3a   : > { %p2071_p13 = pneg %p2070_p12 }
  0x3b   : > { %1873 = dma.hbm_to_vmem [thread:$0]  (!%p2505_p6), %s2901_s5, 256, %s405_s15, [#allocation13], %s2375_s20, %s2375_s20, %s2376_s29  }
  0x3c   : > { %p2078_p3 = pnand %p2077_p4, %p2071_p13 }
  0x3e   : > { %2081 = shalt.err (!%p2078_p3)
}
  0x3f   : > { %s2902_s7 = sld [smem:[#allocation36_spill]]  ;;  %s1660_s10 = sadd.s32 4294967294, %s2370_s26  }
  0x40   : > { %s57_s15 = sadd.s32 1, %s2366_s25  ;;  %s66_s16 = sadd.s32 1, %s2358_s23 }
  0x41   : > { %p59_p1 = scmp.ge.s32.totalorder %s57_s15, 2  ;;  %p73_p3 = scmp.ne.s32.totalorder %s2358_s23, %s2354_s22 }
  0x42   : > { %p74_p5 = scmp.eq.s32.totalorder %s2370_s26, 0  ;;  %p79_p8 = scmp.ne.s32.totalorder %s2354_s22, %s2350_s21 }
  0x43   : > { %s2940_s15 = smov (%p59_p1, %s57_s15), 0  ;;  %p2905_p11 = scmp.eq.s32.totalorder %s2491_s27, 0 }
  0x44   : > { %2903 = sst [smem:[#allocation31_spill]] %s2940_s15  ;;  %p2546_p9 = por %p74_p5, %p73_p3 }
  0x45   : > { %1879 = dma.hbm_to_vmem [thread:$0]  (!%p2505_p6), %s2902_s7, 256, %s429_s17, [#allocation16], %s2375_s20, %s2375_s20, %s2376_s29  }
  0x46   : > { %p2552_p10 = por %p2905_p11, %p79_p8  ;;  %s61_s20 = ssub.s32 %s2366_s25, %s2940_s15 }
  0x47   : > { %p325_p12 = scmp.eq.s32.totalorder %s2491_s27, 1  ;;  %p64_p13 = scmp.eq.s32.totalorder %s61_s20, 0 }
  0x48   : > { %s2906_s17 = scalar_select %p2552_p10, 1, 0 }
  0x49   : > { %p331_p0 = scmp.eq.s32.totalorder %s1660_s10, 1  ;;  %p2559_p2 = por %p325_p12, %p73_p3 }
  0x4a   : > { %p1906_p4 = scmp.lt.s32.totalorder %s2370_s26, 2  ;;  %s2877_s30 = sand.u32 1, %s2358_s23  }
  0x4b   : > { %s2907_s29 = scalar_select %p2559_p2, 1, 0 }
  0x4c   : > { %s2565_s14 = scalar_select %p64_p13, %s2358_s23, %s66_s16  }
  0x4d   : > { %p2567_p1 = por %p331_p0, %p79_p8  ;;  %s2574_s3 = sshll.u32 %s2877_s30, 2 }
  0x4e   : > { %2908 = sst [smem:[#allocation32_spill]] %s2565_s14  ;;  %s2577_s5 = sshll.u32 %s2366_s25, 6 }
  0x4f   : > { %s2909_s11 = scalar_select %p2567_p1, 1, 0 }
  0x50   : > { %p2581_p3 = pnand %p1906_p4, %p2546_p9  ;;  %s478_s16 = sand.u32 1, %s2370_s26  }
  0x51   : > { %2910 = sst [smem:[#allocation33_spill]] %s2909_s11  ;;  %s487_s15 = scalar_lea.hbm %s2860_s1, %s2577_s5 }
  0x52   : > { %s482_s14 = scalar_lea.vmem [#allocation6], %s2574_s3  ;;  %s2377_s30 = smov [#allocation11]  }
  0x53   : > { %s489_s11 = sshll.u32 %s482_s14, 4  ;;  %s394_s21 = sshll.u32 %s2377_s30, 4  ;;  %s490_s11 = int_to_ptr.vmem [resolvable:$true] %s489_s11  ;;  %s395_s21 = int_to_ptr.vmem [resolvable:$true] %s394_s21 }
  0x54   : > { %s2591_s25 = scalar_lea.sflag [#allocation7], %s478_s16  ;;  %p2883_p5 = pneg %p2581_p3 }
  0x55   : > { %s2095_s19 = scalar_lea.vmem %s490_s11, 64  ;;  %s2378_s26 = smov [#allocation6]  }
  0x56   : > { %p2096_p8 = scmp.ne.s32.totalorder %s490_s11, %s2095_s19  ;;  %s2100_s12 = sshll.u32 %s2378_s26, 4  ;;  %s2101_s12 = int_to_ptr.vmem [resolvable:$false] %s2100_s12 }
  0x57   : > { %s2102_s7 = scalar_lea.vmem %s2101_s12, 128  ;;  %p2103_p12 = scmp.lt.s32.totalorder %s490_s11, %s2101_s12 }
  0x58   : > { %p2098_p9 = pnand %p2096_p8, %p2883_p5  ;;  %p2104_p13 = scmp.lt.s32.totalorder %s2102_s7, %s2095_s19 }
  0x5a   : > { %p2099_p11 = pneg %p2098_p9  ;;  %p2105_p0 = por %p2104_p13, %p2103_p12 }
  0x5c   : > { %p2106_p4 = pnand %p2105_p0, %p2099_p11 }
  0x5e   : > { %2109 = shalt.err (!%p2106_p4)
}
  0x5f   : > { %1889 = dma.hbm_to_vmem [thread:$0]  (!%p2581_p3), %s487_s15, 64, %s490_s11, %s2591_s25  }
  0x60   : > { %s2121_s14 = scalar_lea.vmem %s395_s21, 16  ;;  %s2128_s30 = scalar_lea.vmem %s395_s21, 32 }
  0x61   : > { %p2122_p1 = scmp.ne.s32.totalorder %s395_s21, %s2121_s14  ;;  %p2129_p5 = scmp.lt.s32.totalorder %s395_s21, %s395_s21 }
  0x62   : > { %p2130_p2 = scmp.lt.s32.totalorder %s2128_s30, %s2121_s14 }
  0x63   : > { %p2124_p8 = pnand %p2122_p1, %p2511_p7 }
  0x64   : > { %p2131_p10 = por %p2130_p2, %p2129_p5 }
  0x65   : > { %p2125_p9 = pneg %p2124_p8 }
  0x67   : > { %p2132_p6 = pnand %p2131_p10, %p2125_p9 }
  0x69   : > { %2135 = shalt.err (!%p2132_p6)
}
  0x6a   : > { %p2912_p11 = scmp.ne.s32.totalorder %s2898_s13, 0  ;;  %s2379_s15 = smov [#allocation14]  }
  0x6b   : > { %s418_s11 = sshll.u32 %s2379_s15, 4  ;;  %s2380_s16 = smov [#allocation17]   ;;  %s419_s11 = int_to_ptr.vmem [resolvable:$true] %s418_s11 }
  0x6c   : > { %1870 = dma.hbm_to_vmem [thread:$0]  (!%p2912_p11), %s2863_s4, 16, %s395_s21, [#allocation10]  }
  0x6d   : > { %s442_s20 = sshll.u32 %s2380_s16, 4  ;;  %s2147_s19 = scalar_lea.vmem %s419_s11, 16  ;;  %s443_s20 = int_to_ptr.vmem [resolvable:$true] %s442_s20 }
  0x6e   : > { %p2148_p1 = scmp.ne.s32.totalorder %s419_s11, %s2147_s19  ;;  %s2154_s7 = scalar_lea.vmem %s419_s11, 32 }
  0x6f   : > { %p2155_p10 = scmp.lt.s32.totalorder %s419_s11, %s419_s11  ;;  %p2156_p6 = scmp.lt.s32.totalorder %s2154_s7, %s2147_s19 }
  0x70   : > { %p2150_p12 = pnand %p2148_p1, %p2511_p7 }
  0x71   : > { %p2157_p2 = por %p2156_p6, %p2155_p10 }
  0x72   : > { %p2151_p13 = pneg %p2150_p12 }
  0x74   : > { %p2158_p5 = pnand %p2157_p2, %p2151_p13 }
  0x76   : > { %2161 = shalt.err (!%p2158_p5)
}
  0x77   : > { %1876 = dma.hbm_to_vmem [thread:$0]  (!%p2912_p11), %s2865_s6, 16, %s419_s11, [#allocation13]  }
  0x78   : > { %s2173_s30 = scalar_lea.vmem %s443_s20, 16  ;;  %s2180_s12 = scalar_lea.vmem %s443_s20, 32 }
  0x79   : > { %p2174_p0 = scmp.ne.s32.totalorder %s443_s20, %s2173_s30  ;;  %p2181_p9 = scmp.lt.s32.totalorder %s443_s20, %s443_s20 }
  0x7a   : > { %p2182_p1 = scmp.lt.s32.totalorder %s2180_s12, %s2173_s30 }
  0x7b   : > { %p2176_p4 = pnand %p2174_p0, %p2511_p7 }
  0x7c   : > { %p2183_p12 = por %p2182_p1, %p2181_p9 }
  0x7d   : > { %p2177_p8 = pneg %p2176_p4 }
  0x7f   : > { %p2184_p10 = pnand %p2183_p12, %p2177_p8 }
  0x81   : > { %2187 = shalt.err (!%p2184_p10)
}
  0x82   : > { %1882 = dma.hbm_to_vmem [thread:$0]  (!%p2912_p11), %s2867_s8, 16, %s443_s20, [#allocation16]  }
  0x83   : > { %s469_s16 = scalar_lea.hbm %s2859_s0, %s2577_s5  ;;  %s463_s19 = scalar_lea.vmem [#allocation3], %s2574_s3 }
  0x84   : > { %s471_s7 = sshll.u32 %s463_s19, 4  ;;  %s505_s13 = scalar_lea.hbm %s2861_s2, %s2577_s5  ;;  %s472_s7 = int_to_ptr.vmem [resolvable:$true] %s471_s7 }
  0x85   : > { %s2913_s30 = sand.u32 1, %s2358_s23   ;;  %s2201_s26 = scalar_lea.vmem %s472_s7, 64 }
  0x86   : > { %s460_s12 = scalar_lea.sflag [#allocation4], %s2913_s30  ;;  %p2202_p7 = scmp.ne.s32.totalorder %s472_s7, %s2201_s26 }
  0x87   : > { %p2914_p13 = pneg %p2581_p3  ;;  %s2381_s20 = smov [#allocation3]  }
  0x88   : > { %s2206_s15 = sshll.u32 %s2381_s20, 4  ;;  %s2207_s15 = int_to_ptr.vmem [resolvable:$false] %s2206_s15 }
  0x89   : > { %p2204_p6 = pnand %p2202_p7, %p2914_p13  ;;  %s2208_s18 = scalar_lea.vmem %s2207_s15, 128 }
  0x8a   : > { %p2209_p11 = scmp.lt.s32.totalorder %s472_s7, %s2207_s15  ;;  %p2210_p5 = scmp.lt.s32.totalorder %s2208_s18, %s2201_s26 }
  0x8b   : > { %p2205_p2 = pneg %p2204_p6 }
  0x8c   : > { %p2211_p0 = por %p2210_p5, %p2209_p11 }
  0x8e   : > { %p2212_p4 = pnand %p2211_p0, %p2205_p2 }
  0x90   : > { %2215 = shalt.err (!%p2212_p4)
}
  0x91   : > { %1886 = dma.hbm_to_vmem [thread:$0]  (!%p2581_p3), %s469_s16, 64, %s472_s7, %s460_s12  }
  0x92   : > { %s500_s11 = scalar_lea.vmem [#allocation8], %s2574_s3  ;;  %p2915_p9 = pmov %p2914_p13 }
  0x93   : > { %s507_s19 = sshll.u32 %s500_s11, 4  ;;  %s2382_s21 = smov [#allocation8]   ;;  %s508_s19 = int_to_ptr.vmem [resolvable:$true] %s507_s19 }
  0x94   : > { %s2229_s14 = scalar_lea.vmem %s508_s19, 64  ;;  %s2234_s30 = sshll.u32 %s2382_s21, 4  ;;  %s2235_s30 = int_to_ptr.vmem [resolvable:$false] %s2234_s30 }
  0x95   : > { %p2230_p8 = scmp.ne.s32.totalorder %s508_s19, %s2229_s14  ;;  %s2236_s26 = scalar_lea.vmem %s2235_s30, 128 }
  0x96   : > { %p2237_p10 = scmp.lt.s32.totalorder %s508_s19, %s2235_s30  ;;  %p2238_p7 = scmp.lt.s32.totalorder %s2236_s26, %s2229_s14 }
  0x97   : > { %p2232_p1 = pnand %p2230_p8, %p2915_p9 }
  0x98   : > { %p2239_p13 = por %p2238_p7, %p2237_p10 }
  0x99   : > { %p2233_p12 = pneg %p2232_p1 }
  0x9b   : > { %p2240_p6 = pnand %p2239_p13, %p2233_p12 }
  0x9d   : > { %2243 = shalt.err (!%p2240_p6)
}
  0x9e   : > { %1892 = dma.hbm_to_vmem [thread:$0]  (!%p2581_p3), %s505_s13, 64, %s508_s19, %s2591_s25  }
  0x9f   : > { %p2916_p2 = scmp.ne.s32.totalorder %s2897_s28, 0 }
  0xa0   : > { %s2653_s7 = sand.u32 (!%p2916_p2), 1, %s2354_s22   ;;  %p2917_p11 = scmp.ne.s32.totalorder (!%p2916_p2), %s2906_s17, 0 }
  0xa1   : > { %516 = sbr.rel (%p2916_p2) target bundleno = 1561 (0x619), region = 64  ;;  %s2656_s12 = sshll.u32 (!%p2916_p2), %s2653_s7, 2 }
  0xa2   : > { %s519_s10 = scalar_lea.sflag (!%p2916_p2), [#allocation4], %s2653_s7  ;;  %s522_s20 = scalar_lea.vmem (!%p2916_p2), [#allocation3], %s2656_s12 }
  0xa6   : > { %2321 = dma.done.wait (%p2917_p11), %s519_s10, 64  }
  0xa7   : > { %2323 = vsyncadd (%p2917_p11), %s519_s10, 4294967232  ;;  %s527_s5 = sand.u32 1, %s2491_s27   ;;  %s531_s28 = scalar_lea.vmem [#allocation6], %s2656_s12 }
  0xa8   : > { %s528_s25 = scalar_lea.sflag [#allocation7], %s527_s5 }
  0xa9   : > { %2325 = dma.done.wait (%p2917_p11), %s528_s25, 128  }
  0xaa   : > { %2327 = vsyncadd (%p2917_p11), %s528_s25, 4294967168  ;;  %s540_s13 = scalar_lea.vmem [#allocation8], %s2656_s12  ;;  %p2918_p3 = scmp.eq.s32.totalorder %s2491_s27, 0 }
  0xac   : > { %2329 = dma.done.wait (%p2918_p3), [#allocation10], 272   ;;  %p2919_p5 = pmov %p2918_p3 }
  0xad   : > { %p2920_p0 = pmov %p2918_p3 }
  0xae   : > { %2331 = vsyncadd (%p2919_p5), [#allocation10], 4294967024 }
  0xaf   : > { %2333 = dma.done.wait (%p2920_p0), [#allocation13], 272   ;;  %p2921_p4 = pmov %p2920_p0 }
  0xb0   : > { %p2922_p8 = pmov %p2920_p0 }
  0xb1   : > { %2335 = vsyncadd (%p2921_p4), [#allocation13], 4294967024 }
  0xb2   : > { %2337 = dma.done.wait (%p2922_p8), [#allocation16], 272   ;;  %p2923_p9 = pmov %p2920_p0 }
  0xb3   : > { %v2383_v0 = vmov 0.0   ;;  %vm2384_vm0 = vmmov 0   ;;  %v1980_v1 = vld [vmem:[#allocation12 + $0x8] sm:$0xff]   ;;  %v1981_v2 = vld [vmem:[#allocation9 + $0x8] sm:$0xff]   ;;  %v1982_v3 = vld [vmem:[#allocation12] sm:$0xff]   ;;  %vm652_vm1 = vcmask 261120  }
  0xb4   : > { %2339 = vsyncadd (%p2923_p9), [#allocation16], 4294967024  ;;  %1758 = vmatprep.subr.bf16.mxu1 %v2383_v0  ;;  %1750 = vmatprep.subr.bf16.mxu0 %v2383_v0  ;;  %v1983_v4 = vld [vmem:[#allocation9] sm:$0xff]   ;;  %v623_v5 = vld [vmem:[%s531_s28] sm:$0xf]  ;;  %vm837_vm2 = vcmask 64512  }
  0xb5   : > { %1762 = vmatprep.mubr.msk.bf16.mxu1 %vm2384_vm0, %v2383_v0  ;;  %1754 = vmatprep.mubr.msk.bf16.mxu0 %vm2384_vm0, %v2383_v0  ;;  %v622_v6 = vld [vmem:[%s522_s20] sm:$0xf]  ;;  %v1691_v7 = vld [vmem:[#allocation14] ss:$0 sm:$0xff]  ;;  %v1687_v8 = vld [vmem:[#allocation11] ss:$0 sm:$0xff] }
  0xb6   : > { %1759 = vmatpush3.bf16.msra.mxu1 %v1980_v1  ;;  %1751 = vmatpush3.bf16.msra.mxu0 %v1981_v2  ;;  %s2385_s27 = smov 112   ;;  %s2386_s17 = smov 120   ;;  %v1984_v22 = vld [vmem:[#allocation15 + $0x8] sm:$0xff]   ;;  %v1985_v23 = vld [vmem:[#allocation15] sm:$0xff]   ;;  %v624_v24 = vld [vmem:[%s540_s13] sm:$0xf] }
  0xb7   : > { %1760 = vmatprep.subr.bf16.mxu1 %v2383_v0  ;;  %1752 = vmatprep.subr.bf16.mxu0 %v2383_v0  ;;  %s2387_s15 = smov 104   ;;  %v1695_v39 = vld [vmem:[#allocation17] ss:$0 sm:$0xff]  ;;  %vm901_vm3 = vcmask 1043456   ;;  %s1686_s18 = sshll.u32 %s2653_s7, 4  ;;  %vm896_vm4 = vcmask 60416  }
  0xb8   : > { %s2749_s11 = scalar_lea.vmem [#allocation19], %s1686_s18  ;;  %s2388_s21 = smov 8   ;;  %vm1297_vm5 = vcmask 130048   ;;  %vm1299_vm6 = vcmask 195584  }
  0xb9   : > { %s2389_s3 = smov 16   ;;  %s2390_s16 = smov 24  }
  0xba   : > { %1761 = vmatpush3.bf16.msra.mxu1 %v1982_v3  ;;  %1753 = vmatpush3.bf16.msra.mxu0 %v1983_v4  ;;  %s1721_s10 = sshll.u32 %s2362_s24, 8  ;;  %s1426_s20 = sshll.u32 %s2749_s11, 4  ;;  %s2789_s20 = int_to_ptr.vmem [resolvable:$true] %s1426_s20 }
  0xbb   : > { %1774 = vmatprep.subr.bf16.mxu1 %v2383_v0  ;;  %1766 = vmatprep.subr.bf16.mxu0 %v2383_v0  ;;  %s2924_s28 = sld [smem:[#allocation39_spill]]  ;;  %p2925_p12 = scmp.ne.s32.totalorder %s2907_s29, 0 }
  0xbd   : > { %1763 = vmatmul.mubr.msk.bf16.vlgmr.msra.gmra.mxu1 %vm652_vm1, %v623_v5  ;;  %1755 = vmatmul.mubr.msk.bf16.vlgmr.msra.gmra.mxu0 %vm652_vm1, %v622_v6 }
  0xbe   : > { %1776 = vmatprep.mubr.msk.bf16.mxu1 %vm2384_vm0, %v2383_v0  ;;  %1770 = vmatprep.mubr.msk.bf16.mxu0 %vm2384_vm0, %v2383_v0 }
  0xbf   : > { %1767 = vmatpush3.bf16.msra.mxu0 %v1984_v22 }
  0xc0   : > { %1768 = vmatprep.subr.bf16.mxu0 %v2383_v0 }
  0xc1   : > { %s2787_s13 = scalar_lea.hbm %s2924_s28, %s1721_s10 }
  0xc3   : > { %1769 = vmatpush3.bf16.msra.mxu0 %v1985_v23 }
  0xc4   : > { %1780 = vmatprep.subr.bf16.mxu0 %v2383_v0 }
  0xc6   : > { %1771 = vmatmul.mubr.msk.bf16.vlgmr.msra.gmra.mxu0 %vm652_vm1, %v624_v24 }
  0xc7   : > { %1782 = vmatprep.mubr.msk.bf16.mxu0 %vm2384_vm0, %v2383_v0 }
 0x17d   : > { %v760_v9 = vpop.f32.mrf.mxu1  ;;  %v690_v11 = vpop.f32.mrf.mxu0 }
 0x17e   : > { %v761_v10 = vadd.f32 %v1691_v7, %v760_v9  ;;  %v691_v12 = vadd.f32 %v1687_v8, %v690_v11 }
 0x17f   : > { %v1764_v13 = vpop.f32.mrf.mxu1  ;;  %v1756_v15 = vpop.f32.mrf.mxu0 }
 0x180   : > { %v766_v14 = vpack.c.bf16 %v761_v10, %v761_v10  ;;  %v696_v17 = vpack.c.bf16 %v691_v12, %v691_v12 }
 0x181   : > { %v763_v16 = vpop.f32.mrf.mxu1  ;;  %v693_v18 = vpop.f32.mrf.mxu0 }
 0x182   : > { %1062 = vrot.lane.b32.xlu1 %v766_v14, %s2385_s27  ;;  %949 = vrot.lane.b32.xlu0 %v766_v14, %s2386_s17  ;;  %v842_v19 = vsel %vm837_vm2, %v766_v14, 0 }
 0x183   : > { %v1765_v20 = vpop.f32.mrf.mxu1  ;;  %1775 = vmatpush3.bf16.xpose.msra.mxu1 %v842_v19  ;;  %v1757_v21 = vpop.f32.mrf.mxu0 }
 0x184   : > { %1786 = vmatprep.subr.bf16.mxu1 %v2383_v0 }
 0x186   : > { %1060 = vrot.lane.b32.xlu1 %v696_v17, %s2385_s27  ;;  %946 = vrot.lane.b32.xlu0 %v696_v17, %s2386_s17  ;;  %v830_v40 = vpop.f32.mrf.mxu0 }
 0x187   : > { %v831_v41 = vadd.f32 %v1695_v39, %v830_v40 }
 0x188   : > { %v1772_v42 = vpop.f32.mrf.mxu0 }
 0x189   : > { %v836_v43 = vpack.c.bf16 %v831_v41, %v831_v41 }
 0x18a   : > { %1172 = vrot.lane.b32.xlu1 %v696_v17, %s2387_s15  ;;  %1174 = vrot.lane.b32.xlu0 %v766_v14, %s2387_s15  ;;  %v833_v44 = vpop.f32.mrf.mxu0 }
 0x18b   : > { %1777 = vmatmul.mubr.msk.bf16.vlgmr.msra.gmra.mxu1 %vm837_vm2, %v696_v17  ;;  %v903_v45 = vsel %vm901_vm3, %v836_v43, 0 }
 0x18c   : > { %1788 = vmatprep.mubr.msk.bf16.mxu1 %vm2384_vm0, %v2383_v0  ;;  %v1773_v46 = vpop.f32.mrf.mxu0  ;;  %1781 = vmatpush3.bf16.msra.mxu0 %v903_v45  ;;  %v1986_v45 = vld [vmem:[%s2868_s9 + $0x8] sm:$0xff]  }
 0x18d   : > { %1792 = vmatprep.subr.bf16.mxu0 %v2383_v0 }
 0x1f4   : > { %v950_v25 = vpop.permute.xlu0 %949  ;;  %v1063_v27 = vpop.permute.xlu1 %1062 }
 0x1f5   : > { %v955_v26 = vsel %vm837_vm2, %v950_v25, 0  ;;  %v1068_v29 = vsel %vm837_vm2, %v1063_v27, 0 }
 0x1f6   : > { %1787 = vmatpush3.bf16.xpose.msra.mxu1 %v955_v26 }
 0x1f7   : > { %1798 = vmatprep.subr.bf16.mxu1 %v2383_v0 }
 0x1f8   : > { %v947_v28 = vpop.permute.xlu0 %946  ;;  %v1061_v31 = vpop.permute.xlu1 %1060 }
 0x1fc   : > { %v1175_v30 = vpop.permute.xlu0 %1174  ;;  %v1173_v33 = vpop.permute.xlu1 %1172 }
 0x1fd   : > { %1789 = vmatmul.mubr.msk.bf16.vlgmr.msra.gmra.mxu1 %vm837_vm2, %v947_v28  ;;  %v1180_v32 = vsel %vm837_vm2, %v1175_v30, 0 }
 0x1fe   : > { %1799 = vmatpush3.bf16.xpose.msra.mxu1 %v1068_v29  ;;  %1800 = vmatprep.mubr.msk.bf16.mxu1 %vm2384_vm0, %v2383_v0 }
 0x1ff   : > { %1810 = vmatprep.subr.bf16.mxu1 %v2383_v0 }
 0x205   : > { %1801 = vmatmul.mubr.msk.bf16.vlgmr.msra.gmra.mxu1 %vm837_vm2, %v1061_v31 }
 0x206   : > { %1811 = vmatpush3.bf16.xpose.msra.mxu1 %v1180_v32  ;;  %1812 = vmatprep.mubr.msk.bf16.mxu1 %vm2384_vm0, %v2383_v0 }
 0x207   : > { %1822 = vmatprep.subr.bf16.mxu1 %v2383_v0 }
 0x20d   : > { %1813 = vmatmul.mubr.msk.bf16.vlgmr.msra.gmra.mxu1 %vm837_vm2, %v1173_v33 }
 0x20e   : > { %1826 = vmatprep.mubr.msk.bf16.mxu1 %vm2384_vm0, %v2383_v0  ;;  %1823 = vmatpush3.bf16.msra.mxu1 %v1986_v45 }
 0x20f   : > { %1824 = vmatprep.subr.bf16.mxu1 %v2383_v0 }
 0x24b   : > { %v878_v34 = vpop.f32.mrf.mxu1 }
 0x24c   : > { %v884_v35 = vsel %vm837_vm2, %v878_v34, -inf }
 0x24d   : > { %885 = vmax.xlane.f32.xlu0 %v884_v35  ;;  %v1778_v36 = vpop.f32.mrf.mxu1 }
 0x24f   : > { %v881_v37 = vpop.f32.mrf.mxu1 }
 0x251   : > { %v1779_v38 = vpop.f32.mrf.mxu1 }
 0x2bd   : > { %v991_v47 = vpop.f32.mrf.mxu1 }
 0x2be   : > { %v997_v48 = vsel %vm837_vm2, %v991_v47, -inf }
 0x2bf   : > { %998 = vmax.xlane.f32.xlu1 %v997_v48  ;;  %v1790_v49 = vpop.f32.mrf.mxu1  ;;  %v1987_v48 = vld [vmem:[%s2868_s9] sm:$0xff]  }
 0x2c0   : > { %1825 = vmatpush3.bf16.msra.mxu1 %v1987_v48 }
 0x2c1   : > { %v994_v50 = vpop.f32.mrf.mxu1 }
 0x2c3   : > { %v1791_v51 = vpop.f32.mrf.mxu1 }
 0x2c5   : > { %v1104_v52 = vpop.f32.mrf.mxu1 }
 0x2c6   : > { %v1110_v53 = vsel %vm837_vm2, %v1104_v52, -inf }
 0x2c7   : > { %1111 = vmax.xlane.f32.xlu0 %v1110_v53  ;;  %v1802_v54 = vpop.f32.mrf.mxu1 }
 0x2c9   : > { %v1107_v55 = vpop.f32.mrf.mxu1 }
 0x2cb   : > { %v1803_v56 = vpop.f32.mrf.mxu1 }
 0x2cd   : > { %v1216_v57 = vpop.f32.mrf.mxu1 }
 0x2ce   : > { %v1222_v58 = vsel %vm837_vm2, %v1216_v57, -inf }
 0x2cf   : > { %1223 = vmax.xlane.f32.xlu0 %v1222_v58  ;;  %v1814_v59 = vpop.f32.mrf.mxu1 }
 0x2d1   : > { %v1219_v60 = vpop.f32.mrf.mxu1 }
 0x2d3   : > { %v1815_v61 = vpop.f32.mrf.mxu1 }
 0x2d6   : > { %v886_v62 = vpop.xlane.xlu0 %885 }
 0x2d7   : > { %v887_v63 = vsub.f32 %v878_v34, %v886_v62 }
 0x2d9   : > { %v888_v1 = vmul.f32 1.442695, %v887_v63 }
 0x2db   : > { %1988 = vpow2.f32 %v888_v1 }
 0x2e8   : > { %v1989_v2 = vpop.eup %1988 }
 0x2e9   : > { %v890_v3 = vsel %vm837_vm2, %v1989_v2, 0.0 }
 0x2ea   : > { %891 = vadd.xlane.f32.xlu1 %v890_v3 }
 0x2fb   : > { %1012 = vrot.lane.b32.xlu1 %v836_v43, %s2386_s17  ;;  %s2244_s17 = scalar_lea.vmem %s2789_s20, 256 }
 0x2fc   : > { %p2245_p1 = scmp.ne.s32.totalorder %s2789_s20, %s2244_s17 }
 0x2fe   : > { %p2246_p10 = pnand %p2245_p1, %p2925_p12 }
 0x300   : > { %p2247_p7 = pneg %p2246_p10 }
 0x348   : > { %v999_v4 = vpop.xlane.xlu1 %998 }
 0x349   : > { %v1000_v5 = vsub.f32 %v991_v47, %v999_v4 }
 0x34b   : > { %v1001_v6 = vmul.f32 1.442695, %v1000_v5 }
 0x34d   : > { %1990 = vpow2.f32 %v1001_v6 }
 0x350   : > { %v1112_v7 = vpop.xlane.xlu0 %1111 }
 0x351   : > { %v1113_v8 = vsub.f32 %v1104_v52, %v1112_v7 }
 0x353   : > { %v1114_v9 = vmul.f32 1.442695, %v1113_v8 }
 0x355   : > { %1992 = vpow2.f32 %v1114_v9 }
 0x358   : > { %v1224_v10 = vpop.xlane.xlu0 %1223 }
 0x359   : > { %v1225_v11 = vsub.f32 %v1216_v57, %v1224_v10 }
 0x35a   : > { %v1991_v12 = vpop.eup %1990 }
 0x35b   : > { %v1226_v13 = vmul.f32 1.442695, %v1225_v11  ;;  %v1003_v14 = vsel %vm837_vm2, %v1991_v12, 0.0 }
 0x35c   : > { %1004 = vadd.xlane.f32.xlu0 %v1003_v14 }
 0x35d   : > { %1994 = vpow2.f32 %v1226_v13 }
 0x362   : > { %v1993_v15 = vpop.eup %1992 }
 0x363   : > { %v1116_v16 = vsel %vm837_vm2, %v1993_v15, 0.0 }
 0x364   : > { %1117 = vadd.xlane.f32.xlu1 %v1116_v16 }
 0x36a   : > { %v1995_v17 = vpop.eup %1994 }
 0x36b   : > { %v1228_v18 = vsel %vm837_vm2, %v1995_v17, 0.0 }
 0x36c   : > { %1229 = vadd.xlane.f32.xlu0 %v1228_v18 }
 0x373   : > { %v892_v19 = vpop.xlane.xlu1 %891 }
 0x374   : > { %1996 = vrcp.f32 %v892_v19 }
 0x375   : > { %1236 = vrot.lane.b32.xlu1 %v836_v43, %s2387_s15  ;;  %s2391_s15 = smov [#allocation19]  }
 0x376   : > { %s2248_s18 = sshll.u32 %s2391_s15, 4  ;;  %s2249_s18 = int_to_ptr.vmem [resolvable:$false] %s2248_s18 }
 0x377   : > { %v1013_v21 = vpop.permute.xlu1 %1012  ;;  %p2251_p13 = scmp.lt.s32.totalorder %s2789_s20, %s2249_s18 }
 0x378   : > { %v1018_v24 = vsel %vm901_vm3, %v1013_v21, 0 }
 0x381   : > { %v1997_v20 = vpop.eup %1996 }
 0x382   : > { %1124 = vrot.lane.b32.xlu0 %v836_v43, %s2385_s27  ;;  %v894_v22 = vmul.f32 %v1997_v20, %v1989_v2  ;;  %s1396_s27 = scalar_lea.sflag [#allocation20], %s2653_s7 }
 0x384   : > { %v895_v23 = vpack.c.bf16 %v894_v22, %v894_v22 }
 0x386   : > { %897 = vst.msk [vmem:[%s2749_s11] sm:$0xf] %vm896_vm4, %v895_v23  ;;  %1783 = vmatmul.mubr.msk.bf16.vlgmr.msra.gmra.mxu0 %vm837_vm2, %v895_v23 }
 0x387   : > { %1793 = vmatpush3.bf16.msra.mxu0 %v1018_v24  ;;  %1794 = vmatprep.mubr.msk.bf16.mxu0 %vm2384_vm0, %v2383_v0 }
 0x388   : > { %1804 = vmatprep.subr.bf16.mxu0 %v2383_v0 }
 0x3e5   : > { %v1005_v25 = vpop.xlane.xlu0 %1004 }
 0x3e6   : > { %1998 = vrcp.f32 %v1005_v25 }
 0x3ed   : > { %v1118_v26 = vpop.xlane.xlu1 %1117 }
 0x3ee   : > { %2000 = vrcp.f32 %v1118_v26 }
 0x3f1   : > { %v1237_v35 = vpop.permute.xlu1 %1236 }
 0x3f2   : > { %v1242_v37 = vsel %vm901_vm3, %v1237_v35, 0 }
 0x3f3   : > { %v1999_v27 = vpop.eup %1998 }
 0x3f4   : > { %v1007_v28 = vmul.f32 %v1999_v27, %v1991_v12 }
 0x3f5   : > { %v1230_v29 = vpop.xlane.xlu0 %1229 }
 0x3f6   : > { %2002 = vrcp.f32 %v1230_v29  ;;  %v1008_v30 = vpack.c.bf16 %v1007_v28, %v1007_v28 }
 0x3f8   : > { %1702 = vst.msk [vmem:[%s2749_s11 + $0x4] sm:$0xf] %vm896_vm4, %v1008_v30  ;;  %1795 = vmatmul.mubr.msk.bf16.vlgmr.msra.gmra.mxu0 %vm837_vm2, %v1008_v30 }
 0x3f9   : > { %v1125_v31 = vpop.permute.xlu0 %1124  ;;  %1806 = vmatprep.mubr.msk.bf16.mxu0 %vm2384_vm0, %v2383_v0 }
 0x3fa   : > { %v1130_v32 = vsel %vm901_vm3, %v1125_v31, 0 }
 0x3fb   : > { %v2001_v33 = vpop.eup %2000  ;;  %1805 = vmatpush3.bf16.msra.mxu0 %v1130_v32 }
 0x3fc   : > { %1816 = vmatprep.subr.bf16.mxu0 %v2383_v0  ;;  %v1120_v34 = vmul.f32 %v2001_v33, %v1993_v15 }
 0x3fe   : > { %v1121_v36 = vpack.c.bf16 %v1120_v34, %v1120_v34 }
 0x400   : > { %1705 = vst.msk [vmem:[%s2749_s11 + $0x8] sm:$0xf] %vm896_vm4, %v1121_v36  ;;  %1807 = vmatmul.mubr.msk.bf16.vlgmr.msra.gmra.mxu0 %vm837_vm2, %v1121_v36 }
 0x401   : > { %1817 = vmatpush3.bf16.msra.mxu0 %v1242_v37  ;;  %1818 = vmatprep.mubr.msk.bf16.mxu0 %vm2384_vm0, %v2383_v0 }
 0x403   : > { %v2003_v38 = vpop.eup %2002 }
 0x404   : > { %v1232_v39 = vmul.f32 %v2003_v38, %v1995_v17 }
 0x406   : > { %v1233_v40 = vpack.c.bf16 %v1232_v39, %v1232_v39 }
 0x408   : > { %1708 = vst.msk [vmem:[%s2749_s11 + $0xc] sm:$0xf] %vm896_vm4, %v1233_v40  ;;  %1819 = vmatmul.mubr.msk.bf16.vlgmr.msra.gmra.mxu0 %vm837_vm2, %v1233_v40  ;;  %s2250_s11 = scalar_lea.vmem %s2249_s18, 512 }
 0x409   : > { %p2252_p6 = scmp.lt.s32.totalorder %s2250_s11, %s2244_s17 }
 0x40b   : > { %p2253_p2 = por %p2252_p6, %p2251_p13 }
 0x40d   : > { %p2254_p11 = pnand %p2253_p2, %p2247_p7 }
 0x446   : > { %v939_v41 = vpop.f32.mrf.mxu0 }
 0x448   : > { %v1784_v42 = vpop.f32.mrf.mxu0 }
 0x44a   : > { %v942_v43 = vpop.f32.mrf.mxu0 }
 0x44c   : > { %v1785_v44 = vpop.f32.mrf.mxu0 }
 0x4b8   : > { %v1054_v46 = vpop.f32.mrf.mxu0 }
 0x4b9   : > { %1285 = vrot.lane.b32.xlu1 %v1054_v46, %s2388_s21 }
 0x4ba   : > { %v1796_v47 = vpop.f32.mrf.mxu0 }
 0x4bc   : > { %v1057_v49 = vpop.f32.mrf.mxu0 }
 0x4be   : > { %v1797_v50 = vpop.f32.mrf.mxu0 }
 0x4c0   : > { %v1166_v51 = vpop.f32.mrf.mxu0 }
 0x4c1   : > { %1289 = vrot.lane.b32.xlu0 %v1166_v51, %s2389_s3 }
 0x4c2   : > { %v1808_v52 = vpop.f32.mrf.mxu0 }
 0x4c4   : > { %v1169_v53 = vpop.f32.mrf.mxu0 }
 0x4c6   : > { %v1809_v54 = vpop.f32.mrf.mxu0 }
 0x4c8   : > { %v1278_v55 = vpop.f32.mrf.mxu0 }
 0x4c9   : > { %1293 = vrot.lane.b32.xlu1 %v1278_v55, %s2390_s16 }
 0x4ca   : > { %v1820_v0 = vpop.f32.mrf.mxu0 }
 0x4cc   : > { %v1281_v56 = vpop.f32.mrf.mxu0 }
 0x4ce   : > { %v1821_v57 = vpop.f32.mrf.mxu0 }
 0x52b   : > { %v1286_v58 = vpop.permute.xlu1 %1285 }
 0x52c   : > { %v1296_v60 = vsel %vm837_vm2, %v939_v41, %v1286_v58 }
 0x533   : > { %v1290_v59 = vpop.permute.xlu0 %1289 }
 0x534   : > { %v1298_v61 = vsel %vm1297_vm5, %v1296_v60, %v1290_v59 }
 0x53b   : > { %v1294_v62 = vpop.permute.xlu1 %1293 }
 0x53c   : > { %v1300_v63 = vsel %vm1299_vm6, %v1298_v61, %v1294_v62 }
 0x53d   : > { %v1301_v1 = vpack.c.bf16 %v1300_v63, %v1300_v63 }
 0x53f   : > { %1827 = vmatmul.mubr.msk.bf16.vlgmr.msra.gmra.mxu1 %vm652_vm1, %v1301_v1 }
 0x540   : > { %2257 = shalt.err (!%p2254_p11)
}
 0x541   : > { %s2258_s19 = scalar_lea.hbm %s2787_s13, 256  ;;  %s2262_s30 = scalar_lea.hbm %s2924_s28, 512 }
 0x542   : > { %p2259_p3 = scmp.ne.s32.totalorder %s2787_s13, %s2258_s19  ;;  %p2263_p4 = scmp.lt.s32.totalorder %s2787_s13, %s2924_s28 }
 0x543   : > { %p2264_p8 = scmp.lt.s32.totalorder %s2262_s30, %s2258_s19 }
 0x544   : > { %p2260_p5 = pnand %p2259_p3, %p2925_p12 }
 0x545   : > { %p2265_p9 = por %p2264_p8, %p2263_p4 }
 0x546   : > { %p2261_p0 = pneg %p2260_p5 }
 0x548   : > { %p2266_p1 = pnand %p2265_p9, %p2261_p0 }
 0x54a   : > { %2269 = shalt.err (!%p2266_p1)
}
 0x54b   : > { %s2392_s16 = smov 64   ;;  %s2393_s10 = smov 4   ;;  %vm1388_vm7 = vcmask 257024  }
 0x54c   : > { %1861 = dma.vmem_to_hbm [thread:$0]  (%p2925_p12), %s2789_s20, 256, %s2787_s13, %s1396_s27, %s2392_s16, %s2392_s16, %s2393_s10  }
 0x54d   : > { %s2926_s17 = sld [smem:[#allocation37_spill]]  ;;  %s1716_s15 = sshll.u32 %s2362_s24, 6 }
 0x54e   : > { %s612_s18 = scalar_lea.vmem [#allocation18], %s2656_s12  ;;  %s2927_s27 = sld [smem:[#allocation38_spill]] }
 0x54f   : > { %s1410_s11 = sshll.u32 %s612_s18, 4  ;;  %s1391_s14 = scalar_lea.sflag [#allocation5], %s2653_s7  ;;  %s1411_s11 = int_to_ptr.vmem [resolvable:$true] %s1410_s11 }
 0x550   : > { %s2270_s21 = scalar_lea.vmem %s1411_s11, 64  ;;  %s2394_s30 = smov [#allocation18]  }
 0x551   : > { %p2271_p10 = scmp.ne.s32.totalorder %s1411_s11, %s2270_s21  ;;  %s2274_s26 = sshll.u32 %s2394_s30, 4  ;;  %s2275_s26 = int_to_ptr.vmem [resolvable:$false] %s2274_s26 }
 0x552   : > { %s2276_s24 = scalar_lea.vmem %s2275_s26, 128  ;;  %p2277_p6 = scmp.lt.s32.totalorder %s1411_s11, %s2275_s26 }
 0x553   : > { %v1713_v2 = vld [vmem:[%s2926_s17] ss:$0 sm:$0xff]  ;;  %p2272_p7 = pnand %p2271_p10, %p2925_p12  ;;  %p2278_p2 = scmp.lt.s32.totalorder %s2276_s24, %s2270_s21 }
 0x554   : > { %s1408_s19 = scalar_lea.hbm %s2927_s27, %s1716_s15 }
 0x555   : > { %p2273_p13 = pneg %p2272_p7  ;;  %p2279_p11 = por %p2278_p2, %p2277_p6 }
 0x557   : > { %p2280_p3 = pnand %p2279_p11, %p2273_p13 }
 0x5ff   : > { %v1357_v3 = vpop.f32.mrf.mxu1 }
 0x600   : > { %v1374_v4 = vadd.f32 %v1713_v2, %v1357_v3 }
 0x601   : > { %v1828_v5 = vpop.f32.mrf.mxu1 }
 0x602   : > { %1375 = vst.msk [vmem:[#allocation2] sm:$0xff] %vm652_vm1, %v1374_v4 }
 0x603   : > { %v1360_v6 = vpop.f32.mrf.mxu1 }
 0x605   : > { %v1829_v7 = vpop.f32.mrf.mxu1 }
 0x609   : > { %v1386_v8 = vld [vmem:[#allocation2] sm:$0xff] }
 0x60a   : > { %v1387_v9 = vpack.c.bf16 %v1386_v8, %v1386_v8 }
 0x60c   : > { %1389 = vst.msk [vmem:[%s612_s18] sm:$0xf] %vm1388_vm7, %v1387_v9 }
 0x60d   : > { %2283 = shalt.err (!%p2280_p3)
}
 0x60e   : > { %s2284_s12 = scalar_lea.hbm %s1408_s19, 64  ;;  %s2288_s16 = scalar_lea.hbm %s2927_s27, 128 }
 0x60f   : > { %p2285_p5 = scmp.ne.s32.totalorder %s1408_s19, %s2284_s12  ;;  %p2289_p8 = scmp.lt.s32.totalorder %s1408_s19, %s2927_s27 }
 0x610   : > { %p2290_p9 = scmp.lt.s32.totalorder %s2288_s16, %s2284_s12 }
 0x611   : > { %p2286_p0 = pnand %p2285_p5, %p2925_p12 }
 0x612   : > { %p2291_p1 = por %p2290_p9, %p2289_p8 }
 0x613   : > { %p2287_p4 = pneg %p2286_p0 }
 0x615   : > { %p2292_p10 = pnand %p2291_p1, %p2287_p4 }
 0x617   : > { %2295 = shalt.err (!%p2292_p10)
}
 0x618   : > { %1860 = dma.vmem_to_hbm [thread:$0]  (%p2925_p12), %s1411_s11, 64, %s1408_s19, %s1391_s14  }
 0x619 PF: > { %s2928_s25 = sld [smem:[#allocation28_spill]] }
 0x61a   : > { %s2929_s17 = sld [smem:[#allocation33_spill]] }
 0x61b   : > { %s2930_s15 = sld [smem:[#allocation30_spill]] }
 0x61f   : > { %s1441_s18 = sand.u32 1, %s2928_s25  }
 0x620   : > { %p2931_p7 = scmp.ne.s32.totalorder %s2929_s17, 0  ;;  %s1442_s20 = scalar_lea.sflag [#allocation5], %s1441_s18 }
 0x621   : > { %p2932_p13 = scmp.ge.s32.totalorder %s2930_s15, 2 }
 0x623   : > { %p1894_p6 = pnand %p2932_p13, %p2931_p7 }
 0x625   : > { %p1895_p2 = pneg %p1894_p6 }
 0x627   : > { %2341 = dma.done.wait (%p1895_p2), %s1442_s20, 64  }
 0x628   : > { %2343 = vsyncadd (%p1895_p2), %s1442_s20, 4294967232  ;;  %s1451_s13 = scalar_lea.sflag [#allocation20], %s1441_s18 }
 0x629   : > { %2345 = dma.done.wait (%p1895_p2), %s1451_s13, 256  }
 0x62a   : > { %2347 = vsyncadd (%p1895_p2), %s1451_s13, 4294967040  ;;  %s38_s26 = sadd.s32 1, %s2930_s15   ;;  %s2933_s29 = sld [smem:[#allocation32_spill]] }
 0x62b   : > { %p35_p11 = scmp.ge.s32.totalorder %s38_s26, 4   ;;  %s2934_s24 = sld [smem:[#allocation29_spill]] }
 0x62c   : > { %s2935_s25 = sld [smem:[#allocation31_spill]]  ;;  %s2936_s21 = smov %s2354_s22 }
 0x62d   : > { %s2937_s22 = smov %s2358_s23  ;;  %37 = sbr.rel (!%p35_p11) target bundleno = 20 (0x14), region = 196 }
 0x630   : > { %s2938_s23 = smov %s2933_s29 }
 0x632   :  { %1456 = vsyncpa [#allocation4], 1 }
 0x633   :  { %1458 = vsyncpa [#allocation4 + $0x1], 1 }
 0x634   :  { %1459 = vsyncpa [#allocation7], 1 }
 0x635   :  { %1461 = vsyncpa [#allocation7 + $0x1], 1 }
 0x636   :  { %1462 = vsyncpa [#allocation10], 1 }
 0x637   :  { %1463 = vsyncpa [#allocation13], 1 }
 0x638   :  { %1464 = vsyncpa [#allocation16], 1 }
 0x639   :  { %1465 = vsyncpa [#allocation5], 1 }
 0x63a   :  { %1467 = vsyncpa [#allocation5 + $0x1], 1 }
 0x63b   :  { %1468 = vsyncpa [#allocation20], 1 }
 0x63c   :  { %1470 = vsyncpa [#allocation20 + $0x1], 1 }

</bundles_post_ra>
